<compile_context>
chip_gen: v7x
topology: tpu7x:2x2x1
jax: 0.10.0
libtpu: 0.0.40
codegen_flags: <defaults>
</compile_context>

<pallas_src>
import functools

import jax
import jax.numpy as jnp
import numpy as np
from jax import lax
from jax.experimental import pallas as pl
from jax.experimental.pallas import tpu as pltpu

_EPS = 1e-7                        # softmax clamp in RCE (matches the torch code)
_LOG_SMOOTH = float(np.log(1e-4))  # log of the clamped off-target one-hot value
_OUT_LANES = 128                   # lane-dense per-tile output slab width


def _round_up(x, m):
    return ((x + m - 1) // m) * m


def _cdiv(a, b):
    return (a + b - 1) // b


def _pow_gamma(x, gamma):
    """x**gamma without exp/log when gamma is 0.5 or a small integer."""
    if gamma == 0.5:
        return jnp.sqrt(x)
    if float(gamma).is_integer() and 0 <= gamma <= 8:
        g = int(gamma)
        if g == 0:
            return jnp.ones_like(x)
        r = x
        for _ in range(g - 1):
            r = r * x
        return r
    return jnp.power(x, gamma)  # arbitrary gamma: falls back to exp/log on EUP


def _vmem_capacity_bytes():
    try:
        return int(pltpu.get_tpu_info().vmem_capacity_bytes)
    except Exception:
        return 64 << 20  # conservative default (v7x per-core VMEM)


def _nfl_rce_kernel(x_ref, t_ref, out_ref, *, gamma, n_valid, tile_n, class_major):
    """Per-tile NFL + RCE partial sums.

    class_major=False: x_ref is a (tile_n, C) natural-layout block, transposed
                       in-kernel on the MXU to (C, tile_n).
    class_major=True : x_ref is already a (C, tile_n) block (fallback path).
    t_ref: (1, tile_n) int32 targets.
    out_ref: (1, 1, 128) f32 slab -- lane 0 = NFL partial sum, lane 1 = RCE.
    """
    i = pl.program_id(0)

    if class_major:
        x = x_ref[...].astype(jnp.float32)                    # (C, tile_n)
    else:
        xn = x_ref[...]                                       # (tile_n, C)
        c_in = xn.shape[1]
        # Lane-dense transpose via the idle MXU: x[c, m] = sum_k I[c, k]*xn[m, k]
        eye = (lax.broadcasted_iota(jnp.int32, (c_in, c_in), 0) ==
               lax.broadcasted_iota(jnp.int32, (c_in, c_in), 1)).astype(xn.dtype)
        prec = (lax.Precision.HIGHEST if xn.dtype == jnp.float32
                else lax.Precision.DEFAULT)
        x = lax.dot_general(eye, xn,
                            dimension_numbers=(((1,), (1,)), ((), ())),
                            precision=prec,
                            preferred_element_type=jnp.float32)  # (C, tile_n)

    c = x.shape[0]
    t = t_ref[...]                                            # (1, tile_n) int32

    # --- softmax pieces: one exp over the tile, reused for probs AND log-softmax
    m = jnp.max(x, axis=0, keepdims=True)                     # (1, tile_n)
    z = x - m
    exp_z = jnp.exp(z)                                        # (C, tile_n)
    sum_exp = jnp.sum(exp_z, axis=0, keepdims=True)
    logpt = z - jnp.log(sum_exp)                              # log-softmax
    pt = exp_z * (1.0 / sum_exp)                              # softmax probs

    # --- NFL ---
    focal = _pow_gamma(jnp.maximum(1.0 - pt, 0.0), gamma)     # (C, tile_n)
    normalizor = jnp.sum(focal * (-logpt), axis=0, keepdims=True)

    cls = lax.broadcasted_iota(jnp.int32, (c, tile_n), 0)
    onehot = cls == t
    logpt_t = jnp.sum(jnp.where(onehot, logpt, 0.0), axis=0, keepdims=True)
    focal_t = jnp.sum(jnp.where(onehot, focal, 0.0), axis=0, keepdims=True)
    nfl = focal_t * (-logpt_t) / normalizor

    # --- RCE ---
    # -sum_c clamp(pt, eps, 1) * log(clamp(one_hot, 1e-4, 1))
    #   = -log(1e-4) * (sum_c max(pt, eps) - max(pt, eps)[target])
    pred = jnp.maximum(pt, _EPS)          # upper clamp is a no-op (pt <= 1)
    pred_sum = jnp.sum(pred, axis=0, keepdims=True)
    pred_t = jnp.sum(jnp.where(onehot, pred, 0.0), axis=0, keepdims=True)
    rce = (-_LOG_SMOOTH) * (pred_sum - pred_t)

    # --- mask the overhanging tail columns and reduce to two scalars ---
    col = lax.broadcasted_iota(jnp.int32, (1, tile_n), 1)
    valid = (i * tile_n + col) < n_valid
    nfl_sum = jnp.sum(jnp.where(valid, nfl, 0.0), axis=1, keepdims=True)  # (1,1)
    rce_sum = jnp.sum(jnp.where(valid, rce, 0.0), axis=1, keepdims=True)  # (1,1)

    # single lane-dense store per tile: lane 0 = NFL, lane 1 = RCE, rest zero
    lane = lax.broadcasted_iota(jnp.int32, (1, _OUT_LANES), 1)
    row = (jnp.where(lane == 0, nfl_sum, 0.0) +
           jnp.where(lane == 1, rce_sum, 0.0))
    out_ref[...] = row.reshape(1, 1, _OUT_LANES)


def nfl_and_rce(logits, target, *, num_classes=None, alpha=1.0, beta=1.0,
                gamma=0.5, size_average=True, tile_n=16384, min_tiles=4):
    """NFLandRCE forward: logits (N, C) float32/bf16, target (N,) int. -> scalar f32."""
    n, c = logits.shape
    if num_classes is None:
        num_classes = c
    assert num_classes == c, "logits class dim must match num_classes"

    t2d = target.astype(jnp.int32).reshape(1, n)
    x_nat = logits

    # Tiny batches: pad rows up to one 128-lane tile (negligible copy) so a block
    # never exceeds the array extent.  Large batches are NOT padded/transposed in
    # the wrapper; the overhanging tail block is masked in-kernel.
    if n < 128:
        x_nat = jnp.pad(x_nat, ((0, 128 - n), (0, 0)))
        t2d = jnp.pad(t2d, ((0, 0), (0, 128 - n)))
    n_rows = max(n, 128)

    # ---- lane-tile sizing, budgeted against this generation's VMEM ----
    itemsize = jnp.dtype(logits.dtype).itemsize
    c_lane = _round_up(c, 128)   # lane padding of the natural-layout input block
    c_sub = _round_up(c, 8)      # sublane padding of the transposed f32 temporaries
    bytes_per_col = (2 * c_lane * itemsize   # double-buffered logits block
                     + 12 * c_sub * 4        # live (C, tile_n) f32 temporaries
                     + 2 * 8 * 4             # double-buffered target row
                     + 16 * 8 * 4)           # (1, tile_n) row temporaries / slack
    vmem = _vmem_capacity_bytes()
    budget = vmem // 4                       # <= 25% of physical VMEM
    vmem_limit = int(min(vmem // 2, 64 << 20))
    max_cols = max(128, (budget // bytes_per_col) // 128 * 128)

    tile_n = _round_up(max(int(tile_n), 128), 128)
    tile_n = min(tile_n, max_cols)
    # keep >= min_tiles grid steps (when the batch allows) so the ("parallel",)
    # axis feeds both of v7x's TensorCores and the pipeline stays busy.
    tile_n = min(tile_n, max(128, _round_up(_cdiv(n_rows, min_tiles), 128)))
    tile_n = min(tile_n, _round_up(n_rows, 128))
    num_tiles = _cdiv(n_rows, tile_n)

    def _run(class_major, x_arr):
        kern = functools.partial(_nfl_rce_kernel, gamma=float(gamma), n_valid=n,
                                 tile_n=tile_n, class_major=class_major)
        if class_major:
            x_spec = pl.BlockSpec((c, tile_n), lambda i: (0, i))
        else:
            x_spec = pl.BlockSpec((tile_n, c), lambda i: (i, 0))
        return pl.pallas_call(
            kern,
            out_shape=jax.ShapeDtypeStruct((num_tiles, 1, _OUT_LANES), jnp.float32),
            grid_spec=pltpu.PrefetchScalarGridSpec(
                num_scalar_prefetch=0,
                grid=(num_tiles,),
                in_specs=[
                    x_spec,
                    pl.BlockSpec((1, tile_n), lambda i: (0, i)),
                ],
                out_specs=pl.BlockSpec((1, 1, _OUT_LANES), lambda i: (i, 0, 0)),
            ),
            compiler_params=pltpu.CompilerParams(
                dimension_semantics=("parallel",),
                vmem_limit_bytes=vmem_limit),
        )(x_arr, t2d)

    try:
        parts = _run(False, x_nat)              # natural (N, C) layout, no extra HBM pass
    except Exception:
        # Fallback: old wrapper-transposed class-major layout (one extra HBM pass),
        # only taken if the in-kernel MXU transpose fails to lower.
        parts = _run(True, jnp.transpose(x_nat))

    # Final tiny reduction + scale folding in the wrapper.
    nfl_sum = jnp.sum(parts[:, 0, 0])
    rce_sum = jnp.sum(parts[:, 0, 1])
    nfl_total = alpha * (nfl_sum / n if size_average else nfl_sum)
    rce_total = beta * (rce_sum / n)
    return nfl_total + rce_total


def _reference(logits, target, num_classes, alpha=1.0, beta=1.0, gamma=0.5,
               size_average=True):
    x = logits.astype(jnp.float32)
    # NFL
    logpt = jax.nn.log_softmax(x, axis=1)
    normalizor = jnp.sum(-((1.0 - jnp.exp(logpt)) ** gamma) * logpt, axis=1)
    lt = jnp.take_along_axis(logpt, target.reshape(-1, 1), axis=1)[:, 0]
    pt = jnp.exp(lt)
    nfl = alpha * (-((1.0 - pt) ** gamma) * lt) / normalizor
    nfl = jnp.mean(nfl) if size_average else jnp.sum(nfl)
    # RCE
    pred = jnp.clip(jax.nn.softmax(x, axis=1), _EPS, 1.0)
    onehot = jnp.clip(jax.nn.one_hot(target, num_classes, dtype=jnp.float32),
                      1e-4, 1.0)
    rce = -jnp.sum(pred * jnp.log(onehot), axis=1)
    rce = beta * jnp.mean(rce)
    return nfl + rce


if __name__ == "__main__":
    num_classes = 10
    batch = 256  # flattened batch of samples, (N, C) class logits

    key = jax.random.PRNGKey(0)
    k1, k2 = jax.random.split(key)
    logits = jax.random.normal(k1, (batch, num_classes), dtype=jnp.float32)
    target = jax.random.randint(k2, (batch,), 0, num_classes, dtype=jnp.int32)

    loss = nfl_and_rce(logits, target, num_classes=num_classes,
                       alpha=1.0, beta=1.0, gamma=0.5)
    loss = jax.block_until_ready(loss)

    ref = _reference(logits, target, num_classes, alpha=1.0, beta=1.0, gamma=0.5)
    np.testing.assert_allclose(np.asarray(loss), np.asarray(ref),
                               rtol=2e-3, atol=1e-5)
    print("KERNEL_OK")
</pallas_src>

<mosaic_0001>
module attributes {stable_mosaic.version = 11 : i64} {
  func.func @_nfl_rce_kernel(%arg0: i32, %arg1: memref<128x10xf32, #tpu.memory_space<vmem>>, %arg2: memref<1x128xi32, #tpu.memory_space<vmem>>, %arg3: memref<1x1x128xf32, #tpu.memory_space<vmem>>) attributes {dimension_semantics = [#tpu.dimension_semantics<parallel>], iteration_bounds = array<i64: 2>, scalar_prefetch = 0 : i64, scratch_operands = 0 : i64, tpu.core_type = #tpu.core_type<tc>, window_params = [{transform_indices = @transform_0, window_bounds = array<i64: 128, 10>}, {transform_indices = @transform_1, window_bounds = array<i64: 1, 128>}, {transform_indices = @transform_2, window_bounds = array<i64: 1, 1, 128>}]} {
    %c0 = arith.constant 0 : index
    %c0_0 = arith.constant 0 : index
    %0 = vector.load %arg1[%c0, %c0_0] : memref<128x10xf32, #tpu.memory_space<vmem>>, vector<128x10xf32>
    %1 = tpu.iota {dimensions = array<i32: 0>} : vector<10x10xi32>
    %2 = tpu.iota {dimensions = array<i32: 1>} : vector<10x10xi32>
    %3 = arith.cmpi eq, %1, %2 : vector<10x10xi32>
    %4 = arith.extui %3 : vector<10x10xi1> to vector<10x10xi32>
    %5 = arith.sitofp %4 : vector<10x10xi32> to vector<10x10xf32>
    %cst = arith.constant dense<0.000000e+00> : vector<10x128xf32>
    %6 = tpu.matmul %5, %0, %cst {dimension_numbers = #tpu.dot_dimension_numbers<[1], [1], [0], [0], [0, 0, 1, 0], [], []>, precision = #tpu.contract_precision<fp32>} : vector<10x10xf32>, vector<128x10xf32>, vector<10x128xf32> -> vector<10x128xf32>
    %c0_1 = arith.constant 0 : index
    %c0_2 = arith.constant 0 : index
    %7 = vector.load %arg2[%c0_1, %c0_2] : memref<1x128xi32, #tpu.memory_space<vmem>>, vector<1x128xi32>
    %cst_3 = arith.constant dense<0xFF800000> : vector<128xf32>
    %8 = vector.multi_reduction <maximumf>, %6, %cst_3 [0] : vector<10x128xf32> to vector<128xf32>
    %9 = vector.shape_cast %8 : vector<128xf32> to vector<1x128xf32>
    %10 = vector.broadcast %9 : vector<1x128xf32> to vector<10x128xf32>
    %11 = arith.subf %6, %10 : vector<10x128xf32>
    %12 = math.exp %11 : vector<10x128xf32>
    %cst_4 = arith.constant dense<0.000000e+00> : vector<128xf32>
    %13 = vector.multi_reduction <add>, %12, %cst_4 [0] : vector<10x128xf32> to vector<128xf32>
    %14 = vector.shape_cast %13 : vector<128xf32> to vector<1x128xf32>
    %15 = math.log %14 : vector<1x128xf32>
    %16 = vector.broadcast %15 : vector<1x128xf32> to vector<10x128xf32>
    %17 = arith.subf %11, %16 : vector<10x128xf32>
    %cst_5 = arith.constant 1.000000e+00 : f32
    %18 = vector.broadcast %cst_5 : f32 to vector<1x128xf32>
    %19 = arith.divf %18, %14 : vector<1x128xf32>
    %20 = vector.broadcast %19 : vector<1x128xf32> to vector<10x128xf32>
    %21 = arith.mulf %12, %20 : vector<10x128xf32>
    %cst_6 = arith.constant 1.000000e+00 : f32
    %22 = vector.broadcast %cst_6 : f32 to vector<10x128xf32>
    %23 = arith.subf %22, %21 : vector<10x128xf32>
    %cst_7 = arith.constant 0.000000e+00 : f32
    %24 = vector.broadcast %cst_7 : f32 to vector<10x128xf32>
    %25 = arith.maximumf %23, %24 : vector<10x128xf32>
    %26 = math.sqrt %25 : vector<10x128xf32>
    %cst_8 = arith.constant 0.000000e+00 : f32
    %27 = vector.broadcast %cst_8 : f32 to vector<10x128xf32>
    %28 = arith.subf %27, %17 : vector<10x128xf32>
    %29 = arith.mulf %26, %28 : vector<10x128xf32>
    %cst_9 = arith.constant dense<0.000000e+00> : vector<128xf32>
    %30 = vector.multi_reduction <add>, %29, %cst_9 [0] : vector<10x128xf32> to vector<128xf32>
    %31 = vector.shape_cast %30 : vector<128xf32> to vector<1x128xf32>
    %32 = tpu.iota {dimensions = array<i32: 0>} : vector<10x128xi32>
    %33 = vector.broadcast %7 : vector<1x128xi32> to vector<10x128xi32>
    %34 = arith.cmpi eq, %32, %33 : vector<10x128xi32>
    %cst_10 = arith.constant 0.000000e+00 : f32
    %35 = vector.broadcast %cst_10 : f32 to vector<10x128xf32>
    %36 = arith.select %34, %17, %35 : vector<10x128xi1>, vector<10x128xf32>
    %cst_11 = arith.constant dense<0.000000e+00> : vector<128xf32>
    %37 = vector.multi_reduction <add>, %36, %cst_11 [0] : vector<10x128xf32> to vector<128xf32>
    %38 = vector.shape_cast %37 : vector<128xf32> to vector<1x128xf32>
    %cst_12 = arith.constant 0.000000e+00 : f32
    %39 = vector.broadcast %cst_12 : f32 to vector<10x128xf32>
    %40 = arith.select %34, %26, %39 : vector<10x128xi1>, vector<10x128xf32>
    %cst_13 = arith.constant dense<0.000000e+00> : vector<128xf32>
    %41 = vector.multi_reduction <add>, %40, %cst_13 [0] : vector<10x128xf32> to vector<128xf32>
    %42 = vector.shape_cast %41 : vector<128xf32> to vector<1x128xf32>
    %cst_14 = arith.constant 0.000000e+00 : f32
    %43 = vector.broadcast %cst_14 : f32 to vector<1x128xf32>
    %44 = arith.subf %43, %38 : vector<1x128xf32>
    %45 = arith.mulf %42, %44 : vector<1x128xf32>
    %46 = arith.divf %45, %31 : vector<1x128xf32>
    %cst_15 = arith.constant 1.000000e-07 : f32
    %47 = vector.broadcast %cst_15 : f32 to vector<10x128xf32>
    %48 = arith.maximumf %21, %47 : vector<10x128xf32>
    %cst_16 = arith.constant dense<0.000000e+00> : vector<128xf32>
    %49 = vector.multi_reduction <add>, %48, %cst_16 [0] : vector<10x128xf32> to vector<128xf32>
    %50 = vector.shape_cast %49 : vector<128xf32> to vector<1x128xf32>
    %cst_17 = arith.constant 0.000000e+00 : f32
    %51 = vector.broadcast %cst_17 : f32 to vector<10x128xf32>
    %52 = arith.select %34, %48, %51 : vector<10x128xi1>, vector<10x128xf32>
    %cst_18 = arith.constant dense<0.000000e+00> : vector<128xf32>
    %53 = vector.multi_reduction <add>, %52, %cst_18 [0] : vector<10x128xf32> to vector<128xf32>
    %54 = vector.shape_cast %53 : vector<128xf32> to vector<1x128xf32>
    %55 = arith.subf %50, %54 : vector<1x128xf32>
    %cst_19 = arith.constant 9.21034049 : f32
    %56 = vector.broadcast %cst_19 : f32 to vector<1x128xf32>
    %57 = arith.mulf %56, %55 : vector<1x128xf32>
    %58 = tpu.iota {dimensions = array<i32: 1>} : vector<1x128xi32>
    %c128_i32 = arith.constant 128 : i32
    %59 = arith.muli %arg0, %c128_i32 : i32
    %60 = vector.broadcast %59 : i32 to vector<1x128xi32>
    %61 = arith.addi %60, %58 : vector<1x128xi32>
    %c256_i32 = arith.constant 256 : i32
    %62 = vector.broadcast %c256_i32 : i32 to vector<1x128xi32>
    %63 = arith.cmpi slt, %61, %62 : vector<1x128xi32>
    %cst_20 = arith.constant 0.000000e+00 : f32
    %64 = vector.broadcast %cst_20 : f32 to vector<1x128xf32>
    %65 = arith.select %63, %46, %64 : vector<1x128xi1>, vector<1x128xf32>
    %cst_21 = arith.constant dense<0.000000e+00> : vector<1xf32>
    %66 = vector.multi_reduction <add>, %65, %cst_21 [1] : vector<1x128xf32> to vector<1xf32>
    %67 = vector.shape_cast %66 : vector<1xf32> to vector<1x1xf32>
    %cst_22 = arith.constant 0.000000e+00 : f32
    %68 = vector.broadcast %cst_22 : f32 to vector<1x128xf32>
    %69 = arith.select %63, %57, %68 : vector<1x128xi1>, vector<1x128xf32>
    %cst_23 = arith.constant dense<0.000000e+00> : vector<1xf32>
    %70 = vector.multi_reduction <add>, %69, %cst_23 [1] : vector<1x128xf32> to vector<1xf32>
    %71 = vector.shape_cast %70 : vector<1xf32> to vector<1x1xf32>
    %72 = tpu.iota {dimensions = array<i32: 1>} : vector<1x128xi32>
    %c0_i32 = arith.constant 0 : i32
    %73 = vector.broadcast %c0_i32 : i32 to vector<1x128xi32>
    %74 = arith.cmpi eq, %72, %73 : vector<1x128xi32>
    %cst_24 = arith.constant 0.000000e+00 : f32
    %75 = vector.shape_cast %67 : vector<1x1xf32> to vector<1x1xf32>
    %76 = vector.broadcast %75 : vector<1x1xf32> to vector<1x128xf32>
    %77 = vector.broadcast %cst_24 : f32 to vector<1x128xf32>
    %78 = arith.select %74, %76, %77 : vector<1x128xi1>, vector<1x128xf32>
    %c1_i32 = arith.constant 1 : i32
    %79 = vector.broadcast %c1_i32 : i32 to vector<1x128xi32>
    %80 = arith.cmpi eq, %72, %79 : vector<1x128xi32>
    %cst_25 = arith.constant 0.000000e+00 : f32
    %81 = vector.shape_cast %71 : vector<1x1xf32> to vector<1x1xf32>
    %82 = vector.broadcast %81 : vector<1x1xf32> to vector<1x128xf32>
    %83 = vector.broadcast %cst_25 : f32 to vector<1x128xf32>
    %84 = arith.select %80, %82, %83 : vector<1x128xi1>, vector<1x128xf32>
    %85 = arith.addf %78, %84 : vector<1x128xf32>
    %86 = vector.shape_cast %85 : vector<1x128xf32> to vector<1x1x128xf32>
    %c0_26 = arith.constant 0 : index
    %c0_27 = arith.constant 0 : index
    %c0_28 = arith.constant 0 : index
    %87 = vector.load %arg3[%c0_26, %c0_27, %c0_28] : memref<1x1x128xf32, #tpu.memory_space<vmem>>, vector<1x1x128xf32>
    tpu.vector_store %arg3[%c0_26, %c0_27, %c0_28], %86 {strides = array<i32>} : memref<1x1x128xf32, #tpu.memory_space<vmem>>, vector<1x1x128xf32>,
    return
  }
  func.func @transform_0(%arg0: i32) -> (i32, i32) {
    %c0_i32 = arith.constant 0 : i32
    %c0_i32_0 = arith.constant 0 : i32
    return %arg0, %c0_i32 : i32, i32
  }
  func.func @transform_1(%arg0: i32) -> (i32, i32) {
    %c0_i32 = arith.constant 0 : i32
    %c0_i32_0 = arith.constant 0 : i32
    return %c0_i32, %arg0 : i32, i32
  }
  func.func @transform_2(%arg0: i32) -> (i32, i32, i32) {
    %c0_i32 = arith.constant 0 : i32
    %c0_i32_0 = arith.constant 0 : i32
    %c0_i32_1 = arith.constant 0 : i32
    return %arg0, %c0_i32, %c0_i32_0 : i32, i32, i32
  }
}

module attributes {stable_mosaic.version = 11 : i64} {
  func.func @_nfl_rce_kernel(%arg0: i32, %arg1: memref<10x128xf32, #tpu.memory_space<vmem>>, %arg2: memref<1x128xi32, #tpu.memory_space<vmem>>, %arg3: memref<1x1x128xf32, #tpu.memory_space<vmem>>) attributes {dimension_semantics = [#tpu.dimension_semantics<parallel>], iteration_bounds = array<i64: 2>, scalar_prefetch = 0 : i64, scratch_operands = 0 : i64, tpu.core_type = #tpu.core_type<tc>, window_params = [{transform_indices = @transform_0, window_bounds = array<i64: 10, 128>}, {transform_indices = @transform_1, window_bounds = array<i64: 1, 128>}, {transform_indices = @transform_2, window_bounds = array<i64: 1, 1, 128>}]} {
    %c0 = arith.constant 0 : index
    %c0_0 = arith.constant 0 : index
    %0 = vector.load %arg1[%c0, %c0_0] : memref<10x128xf32, #tpu.memory_space<vmem>>, vector<10x128xf32>
    %c0_1 = arith.constant 0 : index
    %c0_2 = arith.constant 0 : index
    %1 = vector.load %arg2[%c0_1, %c0_2] : memref<1x128xi32, #tpu.memory_space<vmem>>, vector<1x128xi32>
    %cst = arith.constant dense<0xFF800000> : vector<128xf32>
    %2 = vector.multi_reduction <maximumf>, %0, %cst [0] : vector<10x128xf32> to vector<128xf32>
    %3 = vector.shape_cast %2 : vector<128xf32> to vector<1x128xf32>
    %4 = vector.broadcast %3 : vector<1x128xf32> to vector<10x128xf32>
    %5 = arith.subf %0, %4 : vector<10x128xf32>
    %6 = math.exp %5 : vector<10x128xf32>
    %cst_3 = arith.constant dense<0.000000e+00> : vector<128xf32>
    %7 = vector.multi_reduction <add>, %6, %cst_3 [0] : vector<10x128xf32> to vector<128xf32>
    %8 = vector.shape_cast %7 : vector<128xf32> to vector<1x128xf32>
    %9 = math.log %8 : vector<1x128xf32>
    %10 = vector.broadcast %9 : vector<1x128xf32> to vector<10x128xf32>
    %11 = arith.subf %5, %10 : vector<10x128xf32>
    %cst_4 = arith.constant 1.000000e+00 : f32
    %12 = vector.broadcast %cst_4 : f32 to vector<1x128xf32>
    %13 = arith.divf %12, %8 : vector<1x128xf32>
    %14 = vector.broadcast %13 : vector<1x128xf32> to vector<10x128xf32>
    %15 = arith.mulf %6, %14 : vector<10x128xf32>
    %cst_5 = arith.constant 1.000000e+00 : f32
    %16 = vector.broadcast %cst_5 : f32 to vector<10x128xf32>
    %17 = arith.subf %16, %15 : vector<10x128xf32>
    %cst_6 = arith.constant 0.000000e+00 : f32
    %18 = vector.broadcast %cst_6 : f32 to vector<10x128xf32>
    %19 = arith.maximumf %17, %18 : vector<10x128xf32>
    %20 = math.sqrt %19 : vector<10x128xf32>
    %cst_7 = arith.constant 0.000000e+00 : f32
    %21 = vector.broadcast %cst_7 : f32 to vector<10x128xf32>
    %22 = arith.subf %21, %11 : vector<10x128xf32>
    %23 = arith.mulf %20, %22 : vector<10x128xf32>
    %cst_8 = arith.constant dense<0.000000e+00> : vector<128xf32>
    %24 = vector.multi_reduction <add>, %23, %cst_8 [0] : vector<10x128xf32> to vector<128xf32>
    %25 = vector.shape_cast %24 : vector<128xf32> to vector<1x128xf32>
    %26 = tpu.iota {dimensions = array<i32: 0>} : vector<10x128xi32>
    %27 = vector.broadcast %1 : vector<1x128xi32> to vector<10x128xi32>
    %28 = arith.cmpi eq, %26, %27 : vector<10x128xi32>
    %cst_9 = arith.constant 0.000000e+00 : f32
    %29 = vector.broadcast %cst_9 : f32 to vector<10x128xf32>
    %30 = arith.select %28, %11, %29 : vector<10x128xi1>, vector<10x128xf32>
    %cst_10 = arith.constant dense<0.000000e+00> : vector<128xf32>
    %31 = vector.multi_reduction <add>, %30, %cst_10 [0] : vector<10x128xf32> to vector<128xf32>
    %32 = vector.shape_cast %31 : vector<128xf32> to vector<1x128xf32>
    %cst_11 = arith.constant 0.000000e+00 : f32
    %33 = vector.broadcast %cst_11 : f32 to vector<10x128xf32>
    %34 = arith.select %28, %20, %33 : vector<10x128xi1>, vector<10x128xf32>
    %cst_12 = arith.constant dense<0.000000e+00> : vector<128xf32>
    %35 = vector.multi_reduction <add>, %34, %cst_12 [0] : vector<10x128xf32> to vector<128xf32>
    %36 = vector.shape_cast %35 : vector<128xf32> to vector<1x128xf32>
    %cst_13 = arith.constant 0.000000e+00 : f32
    %37 = vector.broadcast %cst_13 : f32 to vector<1x128xf32>
    %38 = arith.subf %37, %32 : vector<1x128xf32>
    %39 = arith.mulf %36, %38 : vector<1x128xf32>
    %40 = arith.divf %39, %25 : vector<1x128xf32>
    %cst_14 = arith.constant 1.000000e-07 : f32
    %41 = vector.broadcast %cst_14 : f32 to vector<10x128xf32>
    %42 = arith.maximumf %15, %41 : vector<10x128xf32>
    %cst_15 = arith.constant dense<0.000000e+00> : vector<128xf32>
    %43 = vector.multi_reduction <add>, %42, %cst_15 [0] : vector<10x128xf32> to vector<128xf32>
    %44 = vector.shape_cast %43 : vector<128xf32> to vector<1x128xf32>
    %cst_16 = arith.constant 0.000000e+00 : f32
    %45 = vector.broadcast %cst_16 : f32 to vector<10x128xf32>
    %46 = arith.select %28, %42, %45 : vector<10x128xi1>, vector<10x128xf32>
    %cst_17 = arith.constant dense<0.000000e+00> : vector<128xf32>
    %47 = vector.multi_reduction <add>, %46, %cst_17 [0] : vector<10x128xf32> to vector<128xf32>
    %48 = vector.shape_cast %47 : vector<128xf32> to vector<1x128xf32>
    %49 = arith.subf %44, %48 : vector<1x128xf32>
    %cst_18 = arith.constant 9.21034049 : f32
    %50 = vector.broadcast %cst_18 : f32 to vector<1x128xf32>
    %51 = arith.mulf %50, %49 : vector<1x128xf32>
    %52 = tpu.iota {dimensions = array<i32: 1>} : vector<1x128xi32>
    %c128_i32 = arith.constant 128 : i32
    %53 = arith.muli %arg0, %c128_i32 : i32
    %54 = vector.broadcast %53 : i32 to vector<1x128xi32>
    %55 = arith.addi %54, %52 : vector<1x128xi32>
    %c256_i32 = arith.constant 256 : i32
    %56 = vector.broadcast %c256_i32 : i32 to vector<1x128xi32>
    %57 = arith.cmpi slt, %55, %56 : vector<1x128xi32>
    %cst_19 = arith.constant 0.000000e+00 : f32
    %58 = vector.broadcast %cst_19 : f32 to vector<1x128xf32>
    %59 = arith.select %57, %40, %58 : vector<1x128xi1>, vector<1x128xf32>
    %cst_20 = arith.constant dense<0.000000e+00> : vector<1xf32>
    %60 = vector.multi_reduction <add>, %59, %cst_20 [1] : vector<1x128xf32> to vector<1xf32>
    %61 = vector.shape_cast %60 : vector<1xf32> to vector<1x1xf32>
    %cst_21 = arith.constant 0.000000e+00 : f32
    %62 = vector.broadcast %cst_21 : f32 to vector<1x128xf32>
    %63 = arith.select %57, %51, %62 : vector<1x128xi1>, vector<1x128xf32>
    %cst_22 = arith.constant dense<0.000000e+00> : vector<1xf32>
    %64 = vector.multi_reduction <add>, %63, %cst_22 [1] : vector<1x128xf32> to vector<1xf32>
    %65 = vector.shape_cast %64 : vector<1xf32> to vector<1x1xf32>
    %66 = tpu.iota {dimensions = array<i32: 1>} : vector<1x128xi32>
    %c0_i32 = arith.constant 0 : i32
    %67 = vector.broadcast %c0_i32 : i32 to vector<1x128xi32>
    %68 = arith.cmpi eq, %66, %67 : vector<1x128xi32>
    %cst_23 = arith.constant 0.000000e+00 : f32
    %69 = vector.shape_cast %61 : vector<1x1xf32> to vector<1x1xf32>
    %70 = vector.broadcast %69 : vector<1x1xf32> to vector<1x128xf32>
    %71 = vector.broadcast %cst_23 : f32 to vector<1x128xf32>
    %72 = arith.select %68, %70, %71 : vector<1x128xi1>, vector<1x128xf32>
    %c1_i32 = arith.constant 1 : i32
    %73 = vector.broadcast %c1_i32 : i32 to vector<1x128xi32>
    %74 = arith.cmpi eq, %66, %73 : vector<1x128xi32>
    %cst_24 = arith.constant 0.000000e+00 : f32
    %75 = vector.shape_cast %65 : vector<1x1xf32> to vector<1x1xf32>
    %76 = vector.broadcast %75 : vector<1x1xf32> to vector<1x128xf32>
    %77 = vector.broadcast %cst_24 : f32 to vector<1x128xf32>
    %78 = arith.select %74, %76, %77 : vector<1x128xi1>, vector<1x128xf32>
    %79 = arith.addf %72, %78 : vector<1x128xf32>
    %80 = vector.shape_cast %79 : vector<1x128xf32> to vector<1x1x128xf32>
    %c0_25 = arith.constant 0 : index
    %c0_26 = arith.constant 0 : index
    %c0_27 = arith.constant 0 : index
    %81 = vector.load %arg3[%c0_25, %c0_26, %c0_27] : memref<1x1x128xf32, #tpu.memory_space<vmem>>, vector<1x1x128xf32>
    tpu.vector_store %arg3[%c0_25, %c0_26, %c0_27], %80 {strides = array<i32>} : memref<1x1x128xf32, #tpu.memory_space<vmem>>, vector<1x1x128xf32>,
    return
  }
  func.func @transform_0(%arg0: i32) -> (i32, i32) {
    %c0_i32 = arith.constant 0 : i32
    %c0_i32_0 = arith.constant 0 : i32
    return %c0_i32, %arg0 : i32, i32
  }
  func.func @transform_1(%arg0: i32) -> (i32, i32) {
    %c0_i32 = arith.constant 0 : i32
    %c0_i32_0 = arith.constant 0 : i32
    return %c0_i32, %arg0 : i32, i32
  }
  func.func @transform_2(%arg0: i32) -> (i32, i32, i32) {
    %c0_i32 = arith.constant 0 : i32
    %c0_i32_0 = arith.constant 0 : i32
    %c0_i32_1 = arith.constant 0 : i32
    return %arg0, %c0_i32, %c0_i32_0 : i32, i32, i32
  }
}

</mosaic_0001>

<bundles_post_ra>
// kernel: tpu_custom_call.1
= control target key start
LH: loop header
LB: loop body
LE: loop exit
PB: predicated region body
PF: predicated region fallthrough
CT: control target
= control target key end

     0   :  { %7 = vsyncpa [#allocation3], 0  ;;  %s2200_s0 = inlined_call_operand.vmem [shape: f32[256,10], index: 0, kind: input, shape index: {}]   ;;  %s2201_s1 = inlined_call_operand.vmem [shape: s32[1,256], index: 1, kind: input, shape index: {}]   ;;  %s2202_s2 = inlined_call_operand.hbm [shape: f32[2,1,128], index: 2, kind: output, shape index: {}]  }
   0x1   :  { %9 = vsyncpa [#allocation3 + $0x1], 0  ;;  %s1804_s9 = smov 0   ;;  %s1806_s10 = smov 0  }
   0x2   :  { %s1808_s11 = smov 0   ;;  %s1810_s12 = smov 0  }
   0x3 LB: > { %s1825_s13 = sadd.s32 4294967295, %s1785_s12   ;;  %s1130_s14 = sadd.s32 4294967294, %s1785_s12   ;;  %s1785_s12 = sphi %s1810_s12, %s2208_s12   ;;  %s1781_s11 = sphi %s1808_s11, %s2207_s11   ;;  %s1777_s10 = sphi %s1806_s10, %s2206_s10   ;;  %s1773_s9 = sphi %s1804_s9, %s2205_s9  }
   0x4   : > { %s1829_s15 = sadd.s32 1, %s1785_s12   ;;  %s74_s16 = sadd.s32 1, %s1781_s11 }
   0x5   : > { %s71_s17 = ssub.s32 %s1785_s12, %s1829_s15  ;;  %p84_p0 = scmp.ne.s32.totalorder %s1781_s11, %s1777_s10 }
   0x6   : > { %p72_p1 = scmp.eq.s32.totalorder %s71_s17, 0  ;;  %p85_p2 = scmp.eq.s32.totalorder %s1825_s13, 1 }
   0x7   : > { %p90_p3 = scmp.ne.s32.totalorder %s1777_s10, %s1773_s9  ;;  %p91_p4 = scmp.eq.s32.totalorder %s1130_s14, 1 }
   0x8   : > { %s1840_s18 = scalar_select %p72_p1, %s1781_s11, %s74_s16  }
   0x9   : > { %p1842_p5 = por %p85_p2, %p84_p0  ;;  %p1846_p6 = por %p91_p4, %p90_p3 }
   0xa   : > { %p1133_p7 = scmp.ge.s32.totalorder %s1785_s12, 1  ;;  %p124_p8 = scmp.lt.s32.totalorder %s1785_s12, 3 }
   0xc   : > { %p125_p9 = pnand %p1133_p7, %p124_p8 }
   0xd   : > { %s1853_s21 = sshll.u32 (!%p125_p9), %s1825_s13, 4  ;;  %v173_v0 = vlaneseq (!%p125_p9)  ;;  %vm184_vm1 = vcmask (!%p125_p9), 80896   ;;  %v1787_v6 = vmov (!%p125_p9), 0.0   ;;  %vm924_vm3 = vcmask (!%p125_p9), 1041408   ;;  %p154_p11 = scmp.lt.s32.totalorder (!%p125_p9), %s1825_s13, 1 }
   0xe   : > { %128 = sbr.rel (%p125_p9) target bundleno = 711 (0x2c7), region = 28  ;;  %p149_p10 = scmp.lt.s32.totalorder (!%p125_p9), %s1853_s21, 31 }
   0xf   : > { %v1856_v1 = vshrl.u32 (!%p125_p9), %v173_v0, 7  ;;  %v1858_v2 = vand.u32 (!%p125_p9), 127, %v173_v0  ;;  %s1145_s3 = sshll.u32 (!%p125_p9), %s1825_s13, 7  ;;  %s146_s4 = sand.u32 (!%p125_p9), 1, %s1777_s10  }
  0x10   : > { %s147_s5 = scalar_lea.vmem (!%p125_p9), [#allocation2], %s146_s4  ;;  %s1054_s14 = scalar_lea.sflag (!%p125_p9), [#allocation3], %s146_s4 }
  0x11   : > { %vm178_vm0 = vcmp.eq.s32.totalorder (!%p125_p9), %v1856_v1, %v1858_v2  ;;  %vm1047_vm11 = vcmp.eq.s32.totalorder (!%p125_p9), %v1858_v2, 0  ;;  %vm1049_vm12 = vcmp.eq.s32.totalorder (!%p125_p9), %v1858_v2, 1  ;;  %s1066_s6 = sshll.u32 (!%p125_p9), %s147_s5, 4  ;;  %s1788_s17 = smov (!%p125_p9), [#allocation2]   ;;  %s2160_s6 = int_to_ptr.vmem [resolvable:$true] %s1066_s6 }
  0x12   : > { %v1872_v7 = vsel (!%p125_p9), %vm178_vm0, 1.0, %v1787_v6  ;;  %s1723_s16 = scalar_lea.vmem (!%p125_p9), %s2160_s6, 16 }
  0x13   : > { %v186_v19 = vsel (!%p125_p9), %vm184_vm1, %v1872_v7, 0  ;;  %p1724_p12 = scmp.ne.s32.totalorder (!%p125_p9), %s2160_s6, %s1723_s16 }
  0x14   : > { %v1891_v24 = vsub.f32 (!%p125_p9), %v186_v19, %v186_v19 }
  0x15   : > { %s150_s22 = scalar_select %p149_p10, %s1853_s21, 31 }
  0x16   : > { %v322_v29 = vand.u32 4294901760, %v1891_v24  ;;  %s155_s27 = scalar_select %p154_p11, %s1825_s13, 1 }
  0x17   : > { %s1135_s23 = sshll.u32 %s150_s22, 3  ;;  %s2158_s13 = scalar_lea.hbm %s2202_s2, %s1853_s21 }
  0x18   : > { %s1866_s26 = scalar_lea.vmem %s2200_s0, %s1135_s23  ;;  %v323_v31 = vsub.f32 %v1891_v24, %v322_v29  ;;  %1394 = vmatprep.mubr.f32.mxu0 %v322_v29  ;;  %s156_s30 = scalar_lea.vmem %s2201_s1, %s155_s27 }
  0x19   : > { %v157_v3 = vld [vmem:[%s1866_s26] sm:$0xff]  ;;  %v158_v4 = vld [vmem:[%s1866_s26 + $0x8] sm:$0xff]  ;;  %v159_v5 = vld [vmem:[%s1866_s26 + $0x10] sm:$0xff]  ;;  %p1725_p13 = pnand %p1724_p12, %p1842_p5  ;;  %s1727_s22 = sshll.u32 %s1788_s17, 4  ;;  %s1728_s22 = int_to_ptr.vmem [resolvable:$false] %s1727_s22 }
  0x1a   : > { %v192_v8 = vsel %vm184_vm1, %v157_v3, 0  ;;  %v195_v9 = vsel %vm184_vm1, %v158_v4, 0  ;;  %v160_v10 = vld [vmem:[%s1866_s26 + $0x18] sm:$0xff]  ;;  %v198_v11 = vsel %vm184_vm1, %v159_v5, 0  ;;  %v161_v16 = vld [vmem:[%s1866_s26 + $0x20] sm:$0xff]  ;;  %v162_v17 = vld [vmem:[%s1866_s26 + $0x28] sm:$0xff]  ;;  %p1730_p1 = scmp.lt.s32.totalorder %s2160_s6, %s1728_s22 }
  0x1b   : > { %v240_v12 = vand.u32 4294901760, %v192_v8  ;;  %v243_v13 = vand.u32 4294901760, %v195_v9  ;;  %v201_v14 = vsel %vm184_vm1, %v160_v10, 0  ;;  %v246_v15 = vand.u32 4294901760, %v198_v11  ;;  %v163_v27 = vld [vmem:[%s1866_s26 + $0x30] sm:$0xff]  ;;  %v164_v28 = vld [vmem:[%s1866_s26 + $0x38] sm:$0xff]  ;;  %p1726_p0 = pneg %p1725_p13 }
  0x1c   : > { %v249_v18 = vand.u32 4294901760, %v201_v14  ;;  %v204_v22 = vsel %vm184_vm1, %v161_v16, 0  ;;  %v207_v23 = vsel %vm184_vm1, %v162_v17, 0  ;;  %v210_v32 = vsel %vm184_vm1, %v163_v27, 0  ;;  %v165_v37 = vld [vmem:[%s1866_s26 + $0x40] sm:$0xff]  ;;  %v166_v38 = vld [vmem:[%s1866_s26 + $0x48] sm:$0xff] }
  0x1d   : > { %v1883_v20 = vpack.c.bf16 %v243_v13, %v240_v12  ;;  %v252_v25 = vand.u32 4294901760, %v204_v22  ;;  %v255_v26 = vand.u32 4294901760, %v207_v23  ;;  %v213_v33 = vsel %vm184_vm1, %v164_v28, 0  ;;  %v167_v44 = vld [vmem:[%s1866_s26 + $0x50] sm:$0xff]  ;;  %v168_v45 = vld [vmem:[%s1866_s26 + $0x58] sm:$0xff]  ;;  %v169_v4 = vld [vmem:[%s1866_s26 + $0x60] sm:$0xff] }
  0x1e   : > { %v1885_v21 = vpack.c.bf16 %v249_v18, %v246_v15  ;;  %v324_v34 = vand.u32 4294901760, %v323_v31  ;;  %v258_v35 = vand.u32 4294901760, %v210_v32  ;;  %v261_v36 = vand.u32 4294901760, %v213_v33  ;;  %v170_v5 = vld [vmem:[%s1866_s26 + $0x68] sm:$0xff]  ;;  %v171_v17 = vld [vmem:[%s1866_s26 + $0x70] sm:$0xff]  ;;  %s1729_s23 = scalar_lea.vmem %s1728_s22, 32 }
  0x1f   : > { %1468 = vmatprep.subr.bf16.mxu1 %v1883_v20  ;;  %1564 = vmatprep.subr.bf16.mxu0 %v1883_v20  ;;  %v1900_v30 = vpack.c.bf16 %v255_v26, %v252_v25  ;;  %v216_v40 = vsel %vm184_vm1, %v165_v37, 0  ;;  %v219_v41 = vsel %vm184_vm1, %v166_v38, 0  ;;  %v1921_v46 = vsub.f32 %v192_v8, %v240_v12  ;;  %p1731_p2 = scmp.lt.s32.totalorder %s1729_s23, %s1723_s16 }
  0x20   : > { %1470 = vmatpush3.bf16.xpose.msra.mxu1 %v1883_v20  ;;  %1566 = vmatpush3.bf16.xpose.msra.mxu0 %v1883_v20  ;;  %v1911_v39 = vpack.c.bf16 %v261_v36, %v258_v35  ;;  %v264_v42 = vand.u32 4294901760, %v216_v40  ;;  %v267_v43 = vand.u32 4294901760, %v219_v41  ;;  %v1923_v47 = vsub.f32 %v195_v9, %v243_v13 }
  0x21   : > { %1472 = vmatprep.subr.bf16.mxu1 %v1885_v21  ;;  %1568 = vmatprep.subr.bf16.mxu0 %v1885_v21  ;;  %v222_v49 = vsel %vm184_vm1, %v167_v44, 0  ;;  %v1928_v50 = vsub.f32 %v198_v11, %v246_v15  ;;  %v1930_v51 = vsub.f32 %v201_v14, %v249_v18  ;;  %v225_v52 = vsel %vm184_vm1, %v168_v45, 0  ;;  %v172_v18 = vld [vmem:[%s1866_s26 + $0x78] sm:$0xff]  ;;  %p1732_p3 = por %p1731_p2, %p1730_p1 }
  0x22   : > { %1289 = vmatprep.mubr.f32.mxu1 %v324_v34  ;;  %v1925_v48 = vpack.c.bf16 %v267_v43, %v264_v42  ;;  %v1933_v53 = vsub.f32 %v204_v22, %v252_v25  ;;  %v1935_v54 = vsub.f32 %v207_v23, %v255_v26  ;;  %v1939_v55 = vpack.c.bf16 %v1923_v47, %v1921_v46 }
  0x23   : > { %v1941_v56 = vsub.f32 %v210_v32, %v258_v35  ;;  %v1943_v57 = vsub.f32 %v213_v33, %v261_v36  ;;  %v1947_v58 = vpack.c.bf16 %v1930_v51, %v1928_v50  ;;  %v1951_v59 = vsub.f32 %v216_v40, %v264_v42  ;;  %p1733_p4 = pnand %p1732_p3, %p1726_p0 }
  0x24   : > { %v1953_v60 = vsub.f32 %v219_v41, %v267_v43  ;;  %v1957_v61 = vpack.c.bf16 %v1935_v54, %v1933_v53  ;;  %v270_v62 = vand.u32 4294901760, %v222_v49  ;;  %v273_v63 = vand.u32 4294901760, %v225_v52 }
  0x25   : > { %v1963_v0 = vpack.c.bf16 %v1943_v57, %v1941_v56  ;;  %v228_v9 = vsel %vm184_vm1, %v169_v4, 0  ;;  %v231_v10 = vsel %vm184_vm1, %v170_v5, 0  ;;  %v1988_v16 = vadd.s32 8, %v1856_v1 }
  0x26   : > { %v1967_v3 = vpack.c.bf16 %v1953_v60, %v1951_v59  ;;  %v1971_v8 = vpack.c.bf16 %v273_v63, %v270_v62  ;;  %v1975_v11 = vsub.f32 %v222_v49, %v270_v62  ;;  %v1977_v12 = vsub.f32 %v225_v52, %v273_v63 }
  0x27   : > { %v276_v14 = vand.u32 4294901760, %v228_v9  ;;  %v279_v15 = vand.u32 4294901760, %v231_v10  ;;  %vm179_vm2 = vcmp.eq.s32.totalorder %v1988_v16, %v1858_v2  ;;  %v234_v22 = vsel %vm184_vm1, %v171_v17, 0 }
  0x28   : > { %1474 = vmatpush3.bf16.xpose.msra.mxu1 %v1885_v21  ;;  %1570 = vmatpush3.bf16.xpose.msra.mxu0 %v1885_v21  ;;  %v1983_v13 = vpack.c.bf16 %v1977_v12, %v1975_v11  ;;  %v237_v23 = vsel %vm184_vm1, %v172_v18, 0  ;;  %v2005_v27 = vsel %vm179_vm2, 1.0, %v1787_v6  ;;  %v282_v29 = vand.u32 4294901760, %v234_v22 }
  0x29   : > { %1476 = vmatprep.subr.bf16.mxu1 %v1900_v30  ;;  %1572 = vmatprep.subr.bf16.mxu0 %v1900_v30  ;;  %v1992_v19 = vpack.c.bf16 %v279_v15, %v276_v14  ;;  %v1998_v25 = vsub.f32 %v228_v9, %v276_v14  ;;  %v2000_v26 = vsub.f32 %v231_v10, %v279_v15  ;;  %v285_v31 = vand.u32 4294901760, %v237_v23 }
  0x2a   : > { %v343_v32 = vand.u32 4294901760, %v1921_v46  ;;  %v350_v33 = vand.u32 4294901760, %v1923_v47  ;;  %v189_v34 = vsel %vm184_vm1, %v2005_v27, 0  ;;  %v2021_v37 = vsub.f32 %v234_v22, %v282_v29 }
  0x2b   : > { %v2009_v28 = vpack.c.bf16 %v2000_v26, %v1998_v25  ;;  %v2017_v35 = vpack.c.bf16 %v285_v31, %v282_v29  ;;  %v2023_v38 = vsub.f32 %v237_v23, %v285_v31  ;;  %v2025_v40 = vsub.f32 %v189_v34, %v189_v34 }
  0x2c   : > { %v344_v6 = vsub.f32 %v1921_v46, %v343_v32  ;;  %v351_v36 = vsub.f32 %v1923_v47, %v350_v33  ;;  %v357_v44 = vand.u32 4294901760, %v1928_v50  ;;  %v364_v45 = vand.u32 4294901760, %v1930_v51 }
  0x2d   : > { %v2031_v41 = vpack.c.bf16 %v2023_v38, %v2021_v37  ;;  %v332_v46 = vand.u32 4294901760, %v2025_v40  ;;  %v1595_v49 = vpack.c.bf16 %v350_v33, %v343_v32  ;;  %v371_v9 = vand.u32 4294901760, %v1933_v53 }
  0x2e   : > { %v345_v42 = vand.u32 4294901760, %v344_v6  ;;  %v352_v43 = vand.u32 4294901760, %v351_v36  ;;  %v358_v52 = vsub.f32 %v1928_v50, %v357_v44  ;;  %v365_v62 = vsub.f32 %v1930_v51, %v364_v45 }
  0x2f   : > { %v333_v63 = vsub.f32 %v2025_v40, %v332_v46  ;;  %v378_v10 = vand.u32 4294901760, %v1935_v54  ;;  %v1599_v17 = vpack.c.bf16 %v364_v45, %v357_v44  ;;  %v372_v50 = vsub.f32 %v1933_v53, %v371_v9 }
  0x30   : > { %1478 = vmatpush3.bf16.xpose.msra.mxu1 %v1900_v30  ;;  %1574 = vmatpush3.bf16.xpose.msra.mxu0 %v1900_v30  ;;  %v1499_v47 = vpack.c.bf16 %v352_v43, %v345_v42  ;;  %v359_v4 = vand.u32 4294901760, %v358_v52  ;;  %v366_v5 = vand.u32 4294901760, %v365_v62  ;;  %v385_v23 = vand.u32 4294901760, %v1941_v56 }
  0x31   : > { %1480 = vmatprep.subr.bf16.mxu1 %v1911_v39  ;;  %1576 = vmatprep.subr.bf16.mxu0 %v1911_v39  ;;  %v334_v14 = vand.u32 4294901760, %v333_v63  ;;  %v379_v51 = vsub.f32 %v1935_v54, %v378_v10  ;;  %v373_v18 = vand.u32 4294901760, %v372_v50  ;;  %v392_v29 = vand.u32 4294901760, %v1943_v57 }
  0x32   : > { %v1503_v15 = vpack.c.bf16 %v366_v5, %v359_v4  ;;  %v1603_v54 = vpack.c.bf16 %v378_v10, %v371_v9  ;;  %v386_v31 = vsub.f32 %v1941_v56, %v385_v23  ;;  %v399_v6 = vand.u32 4294901760, %v1951_v59 }
  0x33   : > { %v380_v22 = vand.u32 4294901760, %v379_v51  ;;  %v393_v32 = vsub.f32 %v1943_v57, %v392_v29  ;;  %v406_v36 = vand.u32 4294901760, %v1953_v60  ;;  %v1607_v43 = vpack.c.bf16 %v392_v29, %v385_v23 }
  0x34   : > { %v387_v33 = vand.u32 4294901760, %v386_v31  ;;  %v400_v44 = vsub.f32 %v1951_v59, %v399_v6  ;;  %v427_v4 = vand.u32 4294901760, %v1998_v25  ;;  %v434_v5 = vand.u32 4294901760, %v2000_v26 }
  0x35   : > { %v1507_v53 = vpack.c.bf16 %v380_v22, %v373_v18  ;;  %v394_v34 = vand.u32 4294901760, %v393_v32  ;;  %v407_v45 = vsub.f32 %v1953_v60, %v406_v36  ;;  %v1611_v52 = vpack.c.bf16 %v406_v36, %v399_v6  ;;  %v2120_v36 = vld [vmem:[%s156_s30] ss:$0 sm:$0xff] }
  0x36   : > { %v401_v56 = vand.u32 4294901760, %v400_v44  ;;  %v448_v50 = vand.u32 4294901760, %v2023_v38  ;;  %v1619_v18 = vpack.c.bf16 %v434_v5, %v427_v4  ;;  %vm989_vm4 = vcmp.eq.s32.totalorder %v1856_v1, %v2120_v36 }
  0x37   : > { %v1511_v42 = vpack.c.bf16 %v394_v34, %v387_v33  ;;  %v408_v57 = vand.u32 4294901760, %v407_v45  ;;  %vm990_vm5 = vcmp.eq.s32.totalorder %v1988_v16, %v2120_v36 }
  0x38   : > { %1482 = vmatpush3.bf16.xpose.msra.mxu1 %v1911_v39  ;;  %1578 = vmatpush3.bf16.xpose.msra.mxu0 %v1911_v39  ;;  %v449_v23 = vsub.f32 %v2023_v38, %v448_v50 }
  0x39   : > { %1484 = vmatprep.subr.bf16.mxu1 %v1925_v48  ;;  %1580 = vmatprep.subr.bf16.mxu0 %v1925_v48 }
  0x40   : > { %1486 = vmatpush3.bf16.xpose.msra.mxu1 %v1925_v48  ;;  %1582 = vmatpush3.bf16.xpose.msra.mxu0 %v1925_v48 }
  0x41   : > { %1488 = vmatprep.subr.bf16.mxu1 %v1971_v8  ;;  %1584 = vmatprep.subr.bf16.mxu0 %v1971_v8 }
  0x48   : > { %1490 = vmatpush3.bf16.xpose.msra.mxu1 %v1971_v8  ;;  %1586 = vmatpush3.bf16.xpose.msra.mxu0 %v1971_v8 }
  0x49   : > { %1492 = vmatprep.subr.bf16.mxu1 %v1992_v19  ;;  %1588 = vmatprep.subr.bf16.mxu0 %v1992_v19 }
  0x50   : > { %1494 = vmatpush3.bf16.xpose.msra.mxu1 %v1992_v19  ;;  %1590 = vmatpush3.bf16.xpose.msra.mxu0 %v1992_v19 }
  0x51   : > { %1496 = vmatprep.subr.bf16.mxu1 %v2017_v35  ;;  %1592 = vmatprep.subr.bf16.mxu0 %v2017_v35 }
  0x58   : > { %1498 = vmatpush3.bf16.xpose.msra.mxu1 %v2017_v35  ;;  %1594 = vmatpush3.bf16.xpose.msra.mxu0 %v2017_v35 }
  0x59   : > { %1500 = vmatprep.subr.bf16.mxu1 %v1499_v47  ;;  %1596 = vmatprep.subr.bf16.mxu0 %v1595_v49 }
  0x5f   : > { %1290 = vmatmul.mubr.f32.vlgmr.msra.gmra.mrb[0].mxu1 %v334_v14  ;;  %1395 = vmatmul.mubr.f32.vlgmr.msra.gmra.mrb[0].mxu0 %v332_v46  ;;  %v413_v46 = vand.u32 4294901760, %v1975_v11  ;;  %v428_v14 = vsub.f32 %v1998_v25, %v427_v4 }
  0x60   : > { %1502 = vmatpush3.bf16.xpose.msra.mxu1 %v1499_v47  ;;  %1598 = vmatpush3.bf16.xpose.msra.mxu0 %v1595_v49  ;;  %v420_v47 = vand.u32 4294901760, %v1977_v12  ;;  %v1515_v49 = vpack.c.bf16 %v408_v57, %v401_v56 }
  0x61   : > { %1504 = vmatprep.subr.bf16.mxu1 %v1503_v15  ;;  %1600 = vmatprep.subr.bf16.mxu0 %v1599_v17  ;;  %v414_v62 = vsub.f32 %v1975_v11, %v413_v46  ;;  %v429_v11 = vand.u32 4294901760, %v428_v14 }
  0x62   : > { %1324 = vmatprep.mubr.msk.f32.mxu1 %vm184_vm1, %v1872_v7  ;;  %1429 = vmatprep.mubr.msk.f32.mxu0 %vm184_vm1, %v1872_v7  ;;  %v421_v63 = vsub.f32 %v1977_v12, %v420_v47  ;;  %v1615_v10 = vpack.c.bf16 %v420_v47, %v413_v46 }
  0x63   : > { %v415_v59 = vand.u32 4294901760, %v414_v62 }
  0x64   : > { %v422_v60 = vand.u32 4294901760, %v421_v63 }
  0x66   : > { %v1519_v9 = vpack.c.bf16 %v422_v60, %v415_v59 }
  0x68   : > { %1506 = vmatpush3.bf16.xpose.msra.mxu1 %v1503_v15  ;;  %1602 = vmatpush3.bf16.xpose.msra.mxu0 %v1599_v17  ;;  %v435_v15 = vsub.f32 %v2000_v26, %v434_v5  ;;  %v441_v17 = vand.u32 4294901760, %v2021_v37  ;;  %v450_v26 = vand.u32 4294901760, %v449_v23 }
  0x69   : > { %1508 = vmatprep.subr.bf16.mxu1 %v1507_v53  ;;  %1604 = vmatprep.subr.bf16.mxu0 %v1603_v54 }
  0x6a   : > { %v436_v12 = vand.u32 4294901760, %v435_v15  ;;  %v442_v22 = vsub.f32 %v2021_v37, %v441_v17 }
  0x6c   : > { %v1523_v51 = vpack.c.bf16 %v436_v12, %v429_v11  ;;  %v443_v25 = vand.u32 4294901760, %v442_v22 }
  0x6e   : > { %v1527_v29 = vpack.c.bf16 %v450_v26, %v443_v25 }
  0x70   : > { %1510 = vmatpush3.bf16.xpose.msra.mxu1 %v1507_v53  ;;  %1606 = vmatpush3.bf16.xpose.msra.mxu0 %v1603_v54  ;;  %v1623_v53 = vpack.c.bf16 %v448_v50, %v441_v17 }
  0x71   : > { %1512 = vmatprep.subr.bf16.mxu1 %v1511_v42  ;;  %1608 = vmatprep.subr.bf16.mxu0 %v1607_v43 }
  0x78   : > { %1514 = vmatpush3.bf16.xpose.msra.mxu1 %v1511_v42  ;;  %1610 = vmatpush3.bf16.xpose.msra.mxu0 %v1607_v43 }
  0x79   : > { %1516 = vmatprep.subr.bf16.mxu1 %v1515_v49  ;;  %1612 = vmatprep.subr.bf16.mxu0 %v1611_v52 }
  0x80   : > { %1518 = vmatpush3.bf16.xpose.msra.mxu1 %v1515_v49  ;;  %1614 = vmatpush3.bf16.xpose.msra.mxu0 %v1611_v52 }
  0x81   : > { %1520 = vmatprep.subr.bf16.mxu1 %v1519_v9  ;;  %1616 = vmatprep.subr.bf16.mxu0 %v1615_v10 }
  0x88   : > { %1522 = vmatpush3.bf16.xpose.msra.mxu1 %v1519_v9  ;;  %1618 = vmatpush3.bf16.xpose.msra.mxu0 %v1615_v10 }
  0x89   : > { %1524 = vmatprep.subr.bf16.mxu1 %v1523_v51  ;;  %1620 = vmatprep.subr.bf16.mxu0 %v1619_v18 }
  0x90   : > { %1526 = vmatpush3.bf16.xpose.msra.mxu1 %v1523_v51  ;;  %1622 = vmatpush3.bf16.xpose.msra.mxu0 %v1619_v18 }
  0x91   : > { %1528 = vmatprep.subr.bf16.mxu1 %v1527_v29  ;;  %1624 = vmatprep.subr.bf16.mxu0 %v1623_v53 }
  0x98   : > { %1530 = vmatpush3.bf16.xpose.msra.mxu1 %v1527_v29  ;;  %1626 = vmatpush3.bf16.xpose.msra.mxu0 %v1623_v53 }
  0x99   : > { %1532 = vmatprep.subr.bf16.mxu1 %v1939_v55  ;;  %1628 = vmatprep.subr.bf16.mxu0 %v1883_v20 }
  0x9f   : > { %1325 = vmatmul.mubr.msk.f32.vlgmr.msra.gmra.mrb[0].mxu1 %vm184_vm1, %v2005_v27  ;;  %1430 = vmatmul.mubr.msk.f32.vlgmr.msra.gmra.mrb[0].mxu0 %vm184_vm1, %v2005_v27 }
  0xa0   : > { %1534 = vmatpush3.bf16.xpose.msra.mxu1 %v1939_v55  ;;  %1630 = vmatpush3.bf16.xpose.msra.mxu0 %v1883_v20 }
  0xa1   : > { %1536 = vmatprep.subr.bf16.mxu1 %v1947_v58  ;;  %1632 = vmatprep.subr.bf16.mxu0 %v1885_v21 }
  0xa2   : > { %1359 = vmatprep.mubr.f32.mxu1 %v1891_v24  ;;  %1464 = vmatprep.mubr.msk.f32.mxu0 %vm184_vm1, %v1872_v7 }
  0xa8   : > { %1538 = vmatpush3.bf16.xpose.msra.mxu1 %v1947_v58  ;;  %1634 = vmatpush3.bf16.xpose.msra.mxu0 %v1885_v21 }
  0xa9   : > { %1540 = vmatprep.subr.bf16.mxu1 %v1957_v61  ;;  %1636 = vmatprep.subr.bf16.mxu0 %v1900_v30 }
  0xb0   : > { %1542 = vmatpush3.bf16.xpose.msra.mxu1 %v1957_v61  ;;  %1638 = vmatpush3.bf16.xpose.msra.mxu0 %v1900_v30 }
  0xb1   : > { %1544 = vmatprep.subr.bf16.mxu1 %v1963_v0  ;;  %1640 = vmatprep.subr.bf16.mxu0 %v1911_v39 }
  0xb8   : > { %1546 = vmatpush3.bf16.xpose.msra.mxu1 %v1963_v0  ;;  %1642 = vmatpush3.bf16.xpose.msra.mxu0 %v1911_v39 }
  0xb9   : > { %1548 = vmatprep.subr.bf16.mxu1 %v1967_v3  ;;  %1644 = vmatprep.subr.bf16.mxu0 %v1925_v48 }
  0xc0   : > { %1550 = vmatpush3.bf16.xpose.msra.mxu1 %v1967_v3  ;;  %1646 = vmatpush3.bf16.xpose.msra.mxu0 %v1925_v48 }
  0xc1   : > { %1552 = vmatprep.subr.bf16.mxu1 %v1983_v13  ;;  %1648 = vmatprep.subr.bf16.mxu0 %v1971_v8 }
  0xc8   : > { %1554 = vmatpush3.bf16.xpose.msra.mxu1 %v1983_v13  ;;  %1650 = vmatpush3.bf16.xpose.msra.mxu0 %v1971_v8 }
  0xc9   : > { %1556 = vmatprep.subr.bf16.mxu1 %v2009_v28  ;;  %1652 = vmatprep.subr.bf16.mxu0 %v1992_v19 }
  0xd0   : > { %1558 = vmatpush3.bf16.xpose.msra.mxu1 %v2009_v28  ;;  %1654 = vmatpush3.bf16.xpose.msra.mxu0 %v1992_v19 }
  0xd1   : > { %1560 = vmatprep.subr.bf16.mxu1 %v2031_v41  ;;  %1656 = vmatprep.subr.bf16.mxu0 %v2017_v35 }
  0xd8   : > { %1562 = vmatpush3.bf16.xpose.msra.mxu1 %v2031_v41  ;;  %1658 = vmatpush3.bf16.xpose.msra.mxu0 %v2017_v35 }
  0xdf   : > { %1360 = vmatmul.mubr.f32.vlgmr.msra.gmra.mrb[0].mxu1 %v2025_v40  ;;  %1465 = vmatmul.mubr.msk.f32.vlgmr.msra.gmra.mrb[0].mxu0 %vm184_vm1, %v2005_v27 }
 0x1b2   : > { %v1361_v7 = vpop.f32.mrb[0].mxu1  ;;  %v1466_v20 = vpop.f32.mrb[0].mxu0 }
 0x1b3   : > { %v1659_v21 = vadd.f32 %v1466_v20, %v1361_v7  ;;  %v597_v24 = vpop.f32.mrb[1].mxu1  ;;  %v913_v30 = vpop.f32.mrb[1].mxu0 }
 0x1b4   : > { %v1660_v39 = vadd.f32 %v913_v30, %v597_v24 }
 0x1b5   : > { %v925_v48 = vsel %vm924_vm3, %v1659_v21, -inf }
 0x1b6   : > { %v926_v55 = vmax.f32 %v1660_v39, %v925_v48 }
 0x1b8   : > { %v927_v58 = vrot.slane %v926_v55, 4 }
 0x1ba   : > { %v928_v61 = vmax.f32 %v926_v55, %v927_v58 }
 0x1bc   : > { %v929_v0 = vrot.slane %v928_v61, 2 }
 0x1be   : > { %v930_v3 = vmax.f32 %v928_v61, %v929_v0 }
 0x1c0   : > { %v931_v8 = vrot.slane %v930_v3, 1 }
 0x1c2   : > { %v932_v13 = vmax.f32 %v930_v3, %v931_v8 }
 0x1c4   : > { %v933_v19 = vsub.f32 %v1660_v39, %v932_v13  ;;  %v934_v28 = vsub.f32 %v1659_v21, %v932_v13 }
 0x1c6   : > { %v935_v27 = vmul.f32 1.442695, %v933_v19  ;;  %v937_v35 = vmul.f32 1.442695, %v934_v28 }
 0x1c8   : > { %1709 = vpow2.f32 %v935_v27 }
 0x1c9   : > { %1711 = vpow2.f32 %v937_v35 }
 0x1d2   : > { %v1710_v37 = vpop.eup %1709 }
 0x1d3   : > { %v1712_v38 = vpop.eup %1711 }
 0x1d4   : > { %v939_v40 = vsel %vm924_vm3, %v1712_v38, 0.0 }
 0x1d5   : > { %v940_v41 = vadd.f32 %v1710_v37, %v939_v40 }
 0x1d7   : > { %v941_v54 = vrot.slane %v940_v41, 4 }
 0x1d9   : > { %v942_v31 = vadd.f32 %v941_v54, %v940_v41 }
 0x1db   : > { %v943_v32 = vrot.slane %v942_v31, 2 }
 0x1dd   : > { %v944_v33 = vadd.f32 %v943_v32, %v942_v31 }
 0x1df   : > { %v945_v34 = vrot.slane %v944_v33, 1 }
 0x1e1   : > { %v946_v6 = vadd.f32 %v945_v34, %v944_v33 }
 0x1e3   : > { %1713 = vlog2.f32 %v946_v6 }
 0x1e4   : > { %1715 = vrcp.f32 %v946_v6 }
 0x1ed   : > { %v1714_v42 = vpop.eup %1713 }
 0x1ee   : > { %v1716_v43 = vpop.eup %1715  ;;  %v948_v44 = vmul.f32 0.6931472, %v1714_v42 }
 0x1ef   : > { %v953_v45 = vmul.f32 %v1716_v43, %v1710_v37  ;;  %v954_v56 = vmul.f32 %v1716_v43, %v1712_v38 }
 0x1f0   : > { %v949_v57 = vsub.f32 %v933_v19, %v948_v44  ;;  %v950_v46 = vsub.f32 %v934_v28, %v948_v44 }
 0x1f1   : > { %v955_v47 = vsub.f32 1.0, %v953_v45  ;;  %v956_v49 = vsub.f32 1.0, %v954_v56  ;;  %v1015_v52 = vmax.f32 %v953_v45, 1e-07  ;;  %v1016_v62 = vmax.f32 %v954_v56, 1e-07 }
 0x1f2   : > { %v991_v63 = vsel %vm989_vm4, %v949_v57, 0.0  ;;  %v992_v59 = vsel %vm990_vm5, %v950_v46, 0.0  ;;  %v973_v53 = vsub.f32 0.0, %v949_v57  ;;  %v974_v7 = vsub.f32 0.0, %v950_v46 }
 0x1f3   : > { %v957_v60 = vmax.f32 %v955_v47, 0.0  ;;  %v958_v4 = vmax.f32 %v956_v49, 0.0  ;;  %v993_v5 = vsel %vm924_vm3, %v992_v59, 0.0  ;;  %v1017_v10 = vsel %vm924_vm3, %v1016_v62, 0.0 }
 0x1f4   : > { %v994_v9 = vadd.f32 %v993_v5, %v991_v63  ;;  %v1026_v14 = vsel %vm990_vm5, %v1016_v62, 0.0  ;;  %v1025_v15 = vsel %vm989_vm4, %v1015_v52, 0.0  ;;  %v1018_v11 = vadd.f32 %v1017_v10, %v1015_v52 }
 0x1f5   : > { %1717 = vrsqrt.f32 %v957_v60  ;;  %v1027_v12 = vsel %vm924_vm3, %v1026_v14, 0.0  ;;  %vm961_vm6 = vcmp.eq.f32.partialorder %v957_v60, inf  ;;  %vm963_vm7 = vcmp.eq.f32.partialorder %v957_v60, 0.0 }
 0x1f6   : > { %1719 = vrsqrt.f32 %v958_v4  ;;  %v1028_v17 = vadd.f32 %v1027_v12, %v1025_v15  ;;  %v1019_v50 = vrot.slane %v1018_v11, 4  ;;  %v995_v18 = vrot.slane %v994_v9, 4 }
 0x1f7   : > { %v964_v48 = vand.u32 2147483648, %v957_v60  ;;  %vm968_vm8 = vcmp.eq.f32.partialorder %v958_v4, inf  ;;  %vm970_vm9 = vcmp.eq.f32.partialorder %v958_v4, 0.0  ;;  %v971_v0 = vand.u32 2147483648, %v958_v4 }
 0x1f8   : > { %v1029_v51 = vrot.slane %v1028_v17, 4  ;;  %v1020_v22 = vadd.f32 %v1019_v50, %v1018_v11  ;;  %v996_v20 = vadd.f32 %v995_v18, %v994_v9 }
 0x1fa   : > { %v1030_v23 = vadd.f32 %v1029_v51, %v1028_v17  ;;  %v1021_v25 = vrot.slane %v1020_v22, 2  ;;  %v997_v19 = vrot.slane %v996_v20, 2 }
 0x1fc   : > { %v1031_v26 = vrot.slane %v1030_v23, 2  ;;  %v1022_v21 = vadd.f32 %v1021_v25, %v1020_v22  ;;  %v998_v34 = vadd.f32 %v997_v19, %v996_v20 }
 0x1fe   : > { %v1032_v39 = vadd.f32 %v1031_v26, %v1030_v23  ;;  %v1023_v58 = vrot.slane %v1022_v21, 1  ;;  %v999_v44 = vrot.slane %v998_v34, 1 }
 0x1ff   : > { %v1718_v29 = vpop.eup %1717 }
 0x200   : > { %v1720_v24 = vpop.eup %1719  ;;  %v960_v30 = vmul.f32 %v1718_v29, %v957_v60  ;;  %v1033_v3 = vrot.slane %v1032_v39, 1  ;;  %v1024_v28 = vadd.f32 %v1023_v58, %v1022_v21  ;;  %v1000_v46 = vadd.f32 %v999_v44, %v998_v34 }
 0x201   : > { %v967_v55 = vmul.f32 %v1720_v24, %v958_v4 }
 0x202   : > { %v962_v61 = vsel %vm961_vm6, %v957_v60, %v960_v30  ;;  %v1034_v38 = vadd.f32 %v1033_v3, %v1032_v39  ;;  %v1011_v62 = vsub.f32 0.0, %v1000_v46  ;;  %v1038_v60 = vstv %s1145_s3 }
 0x203   : > { %v965_v8 = vsel %vm963_vm7, %v964_v48, %v962_v61  ;;  %v969_v13 = vsel %vm968_vm8, %v958_v4, %v967_v55  ;;  %v1039_v4 = vadd.s32 %v1038_v60, %v1858_v2 }
 0x204   : > { %v972_v27 = vsel %vm970_vm9, %v971_v0, %v969_v13  ;;  %v975_v35 = vmul.f32 %v973_v53, %v965_v8  ;;  %v1001_v37 = vsel %vm989_vm4, %v965_v8, 0.0  ;;  %v1035_v31 = vsub.f32 %v1024_v28, %v1034_v38 }
 0x205   : > { %v976_v40 = vmul.f32 %v974_v7, %v972_v27  ;;  %v1002_v41 = vsel %vm990_vm5, %v972_v27, 0.0  ;;  %vm1040_vm10 = vcmp.lt.s32.totalorder %v1039_v4, 256 }
 0x206   : > { %v1003_v54 = vsel %vm924_vm3, %v1002_v41, 0.0  ;;  %v1036_v14 = vmul.f32 9.2103405, %v1035_v31 }
 0x207   : > { %v977_v32 = vsel %vm924_vm3, %v976_v40, 0.0  ;;  %v1004_v33 = vadd.f32 %v1003_v54, %v1001_v37 }
 0x208   : > { %v978_v6 = vadd.f32 %v977_v32, %v975_v35  ;;  %v1044_v15 = vsel %vm1040_vm10, %v1036_v14, 0.0 }
 0x209   : > { %v1005_v42 = vrot.slane %v1004_v33, 4 }
 0x20a   : > { %v979_v43 = vrot.slane %v978_v6, 4 }
 0x20b   : > { %v1006_v1 = vadd.f32 %v1005_v42, %v1004_v33 }
 0x20c   : > { %v980_v45 = vadd.f32 %v979_v43, %v978_v6 }
 0x20d   : > { %v1007_v56 = vrot.slane %v1006_v1, 2 }
 0x20e   : > { %v981_v57 = vrot.slane %v980_v45, 2 }
 0x20f   : > { %v1008_v47 = vadd.f32 %v1007_v56, %v1006_v1 }
 0x210   : > { %v982_v16 = vadd.f32 %v981_v57, %v980_v45 }
 0x211   : > { %v1009_v36 = vrot.slane %v1008_v47, 1 }
 0x212   : > { %v983_v49 = vrot.slane %v982_v16, 1 }
 0x213   : > { %v1010_v52 = vadd.f32 %v1009_v36, %v1008_v47 }
 0x214   : > { %v984_v63 = vadd.f32 %v983_v49, %v982_v16 }
 0x215   : > { %v1012_v59 = vmul.f32 %v1011_v62, %v1010_v52 }
 0x216   : > { %1721 = vrcp.f32 %v984_v63 }
 0x220   : > { %v1722_v5 = vpop.eup %1721 }
 0x221   : > { %v1014_v9 = vmul.f32 %v1722_v5, %v1012_v59 }
 0x223   : > { %v1041_v10 = vsel %vm1040_vm10, %v1014_v9, 0.0 }
 0x224   : > { %1042 = vadd.xlane.f32.xlu0 %v1041_v10 }
 0x228   : > { %1045 = vadd.xlane.f32.xlu0 %v1044_v15 }
 0x2b1   : > { %v1043_v11 = vpop.xlane.xlu0 %1042 }
 0x2b2   : > { %v1048_v17 = vsel %vm1047_vm11, %v1043_v11, 0.0 }
 0x2b5   : > { %v1046_v12 = vpop.xlane.xlu0 %1045 }
 0x2b6   : > { %v1050_v50 = vsel %vm1049_vm12, %v1046_v12, 0.0 }
 0x2b7   : > { %v1051_v51 = vadd.f32 %v1050_v50, %v1048_v17 }
 0x2b9   : > { %1052 = vst [vmem:[%s147_s5] sm:$0x1] %v1051_v51 }
 0x2ba   : > { %1736 = shalt.err (!%p1733_p4)
}
 0x2bb   : > { %s1737_s21 = scalar_lea.hbm %s2158_s13, 16  ;;  %s1741_s26 = scalar_lea.hbm %s2202_s2, 32 }
 0x2bc   : > { %p1738_p7 = scmp.ne.s32.totalorder %s2158_s13, %s1737_s21  ;;  %p1742_p10 = scmp.lt.u32.totalorder %s2158_s13, %s2202_s2 }
 0x2bd   : > { %p1743_p11 = scmp.lt.u32.totalorder %s1741_s26, %s1737_s21  ;;  %p1745_p13 = scmp.lt.u32.totalorder %s1737_s21, %s2158_s13 }
 0x2be   : > { %p1739_p8 = pnand %p1738_p7, %p1842_p5 }
 0x2bf   : > { %p1744_p12 = por %p1743_p11, %p1742_p10 }
 0x2c0   : > { %p1740_p9 = pneg %p1739_p8 }
 0x2c1   : > { %p1746_p0 = por %p1745_p13, %p1744_p12 }
 0x2c3   : > { %p1747_p1 = pnand %p1746_p0, %p1740_p9 }
 0x2c5   : > { %1750 = shalt.err (!%p1747_p1)
}
 0x2c6   : > { %1669 = dma.vmem_to_hbm [thread:$0]  (%p1842_p5), %s2160_s6, 16, %s2158_s13, %s1054_s14  }
 0x2c7 PF: > { %p1675_p2 = scmp.ge.s32.totalorder %s1785_s12, 2  ;;  %s1078_s29 = sand.u32 1, %s1773_s9  }
 0x2c8   : > { %s1079_s30 = scalar_lea.sflag [#allocation3], %s1078_s29 }
 0x2c9   : > { %p1672_p3 = pnand %p1675_p2, %p1846_p6 }
 0x2cb   : > { %1768 = dma.done.wait (!%p1672_p3), %s1079_s30, 16  }
 0x2cc   : > { %1770 = vsyncadd (!%p1672_p3), %s1079_s30, 4294967280  ;;  %p12_p4 = scmp.ge.s32.totalorder %s1829_s15, 4   ;;  %s2205_s9 = smov %s1777_s10 }
 0x2cd   : > { %s2206_s10 = smov %s1781_s11  ;;  %s2207_s11 = smov %s1840_s18 }
 0x2ce   : > { %s2208_s12 = smov %s1829_s15  ;;  %14 = sbr.rel (!%p12_p4) target bundleno = 3 (0x3), region = 66 }
 0x2d5   :  { %1083 = vsyncpa [#allocation3], 1 }
 0x2d6   :  { %1085 = vsyncpa [#allocation3 + $0x1], 1 }

// kernel: tpu_custom_call.1
= control target key start
LH: loop header
LB: loop body
LE: loop exit
PB: predicated region body
PF: predicated region fallthrough
CT: control target
= control target key end

     0   :  { %7 = vsyncpa [#allocation3], 0  ;;  %s776_s0 = inlined_call_operand.hbm [shape: f32[10,256], index: 0, kind: input, shape index: {}]   ;;  %s777_s1 = inlined_call_operand.vmem [shape: s32[1,256], index: 1, kind: input, shape index: {}]   ;;  %s778_s2 = inlined_call_operand.hbm [shape: f32[2,1,128], index: 2, kind: output, shape index: {}]  }
   0x1   :  { %9 = vsyncpa [#allocation3 + $0x1], 0 }
   0x2   :  { %10 = vsyncpa [#allocation4], 0 }
   0x3   :  { %12 = vsyncpa [#allocation4 + $0x1], 0  ;;  %s592_s9 = smov 0   ;;  %s594_s10 = smov 0  }
   0x4   :  { %s596_s11 = smov 0   ;;  %s598_s12 = smov 0  }
   0x5 LB: > { %s613_s13 = sadd.s32 4294967295, %s570_s12   ;;  %s399_s14 = sadd.s32 4294967294, %s570_s12   ;;  %s570_s12 = sphi %s598_s12, %s792_s12   ;;  %s566_s11 = sphi %s596_s11, %s791_s11   ;;  %s562_s10 = sphi %s594_s10, %s790_s10   ;;  %s558_s9 = sphi %s592_s9, %s789_s9  }
   0x6   : > { %s617_s15 = sadd.s32 1, %s570_s12   ;;  %s25_s16 = sadd.s32 1, %s566_s11 }
   0x7   : > { %s22_s17 = ssub.s32 %s570_s12, %s617_s15  ;;  %p32_p0 = scmp.ne.s32.totalorder %s566_s11, %s562_s10 }
   0x8   : > { %p23_p1 = scmp.eq.s32.totalorder %s22_s17, 0  ;;  %p33_p2 = scmp.eq.s32.totalorder %s570_s12, 0 }
   0x9   : > { %p38_p3 = scmp.ne.s32.totalorder %s562_s10, %s558_s9  ;;  %p39_p4 = scmp.eq.s32.totalorder %s613_s13, 0 }
   0xa   : > { %s629_s18 = scalar_select %p23_p1, %s566_s11, %s25_s16  }
   0xb   : > { %p631_p5 = por %p33_p2, %p32_p0  ;;  %p635_p6 = por %p39_p4, %p38_p3 }
   0xc   : > { %p88_p7 = scmp.eq.s32.totalorder %s613_s13, 1  ;;  %p94_p8 = scmp.eq.s32.totalorder %s399_s14, 1 }
   0xd   : > { %p423_p10 = scmp.lt.s32.totalorder %s570_s12, 2  ;;  %s114_s23 = sand.u32 1, %s566_s11  }
   0xe   : > { %p642_p11 = por %p88_p7, %p32_p0  ;;  %p646_p12 = por %p94_p8, %p38_p3 }
   0xf   : > { %s403_s24 = sshll.u32 %s570_s12, 7  ;;  %s402_s25 = sshll.u32 %s114_s23, 4 }
  0x10   : > { %s782_s21 = scalar_select %p642_p11, 1, 0 }
  0x11   : > { %s783_s22 = scalar_select %p646_p12, 1, 0 }
  0x12   : > { %s655_s28 = scalar_lea.hbm %s776_s0, %s403_s24  ;;  %s118_s29 = scalar_lea.vmem [#allocation2], %s402_s25 }
  0x13   : > { %s124_s30 = sshll.u32 %s118_s29, 4  ;;  %p659_p13 = pnand %p423_p10, %p631_p5  ;;  %s663_s30 = int_to_ptr.vmem [resolvable:$true] %s124_s30 }
  0x14   : > { %s666_s4 = scalar_lea.sflag [#allocation3], %s114_s23  ;;  %s474_s5 = scalar_lea.hbm %s655_s28, 256 }
  0x15   : > { %p475_p1 = scmp.ne.s32.totalorder %s655_s28, %s474_s5  ;;  %p476_p2 = pneg %p659_p13 }
  0x16   : > { %s479_s8 = scalar_lea.hbm %s776_s0, 512  ;;  %p480_p5 = scmp.lt.u32.totalorder %s655_s28, %s776_s0 }
  0x17   : > { %p477_p3 = pnand %p476_p2, %p475_p1  ;;  %p481_p7 = scmp.lt.u32.totalorder %s479_s8, %s474_s5 }
  0x18   : > { %p483_p10 = scmp.lt.u32.totalorder %s474_s5, %s655_s28 }
  0x19   : > { %p478_p4 = pneg %p477_p3  ;;  %p482_p8 = por %p481_p7, %p480_p5 }
  0x1b   : > { %p484_p9 = por %p483_p10, %p482_p8 }
  0x1d   : > { %p485_p0 = pnand %p484_p9, %p478_p4 }
  0x1f   : > { %488 = shalt.err (!%p485_p0)
}
  0x20   : > { %s489_s17 = scalar_lea.vmem %s663_s30, 256  ;;  %s572_s19 = smov [#allocation2]  }
  0x21   : > { %p490_p1 = scmp.ne.s32.totalorder %s663_s30, %s489_s17  ;;  %s494_s23 = sshll.u32 %s572_s19, 4  ;;  %s495_s23 = int_to_ptr.vmem [resolvable:$false] %s494_s23 }
  0x22   : > { %s496_s24 = scalar_lea.vmem %s495_s23, 512  ;;  %p497_p11 = scmp.lt.s32.totalorder %s663_s30, %s495_s23 }
  0x23   : > { %p492_p3 = pnand %p490_p1, %p476_p2  ;;  %p498_p5 = scmp.lt.s32.totalorder %s496_s24, %s489_s17 }
  0x25   : > { %p493_p12 = pneg %p492_p3  ;;  %p499_p7 = por %p498_p5, %p497_p11 }
  0x27   : > { %p500_p8 = pnand %p499_p7, %p493_p12 }
  0x29   : > { %503 = shalt.err (!%p500_p8)
}
  0x2a   : > { %s573_s25 = smov 256   ;;  %s574_s26 = smov 128  }
  0x2b   : > { %s575_s27 = smov 8   ;;  %p138_p9 = scmp.lt.s32.totalorder %s570_s12, 3 }
  0x2c   : > { %418 = dma.hbm_to_vmem [thread:$0]  (!%p659_p13), %s655_s28, 256, %s663_s30, %s666_s4, %s573_s25, %s574_s26, %s575_s27  }
  0x2d   : > { %p785_p0 = scmp.ge.s32.totalorder %s570_s12, 1 }
  0x2f   : > { %p139_p2 = pnand %p785_p0, %p138_p9 }
  0x30   : > { %s698_s29 = sand.u32 (!%p139_p2), 1, %s562_s10  }
  0x31   : > { %142 = sbr.rel (%p139_p2) target bundleno = 332 (0x14c), region = 28  ;;  %s405_s5 = sshll.u32 (!%p139_p2), %s698_s29, 4 }
  0x32   : > { %s145_s6 = scalar_lea.sflag (!%p139_p2), [#allocation3], %s698_s29  ;;  %s148_s7 = scalar_lea.vmem (!%p139_p2), [#allocation2], %s405_s5 }
  0x38   : > { %549 = dma.done.wait (%p635_p6), %s145_s6, 256  }
  0x39   : > { %551 = vsyncadd (%p635_p6), %s145_s6, 4294967040  ;;  %vm177_vm0 = vcmask 1041408   ;;  %v174_v0 = vld [vmem:[%s148_s7] sm:$0xff]  ;;  %v175_v1 = vld [vmem:[%s148_s7 + $0x8] sm:$0x3]  ;;  %p171_p6 = scmp.lt.s32.totalorder %s613_s13, 1  ;;  %v238_v24 = vlaneseq }
  0x3a   : > { %v178_v2 = vsel %vm177_vm0, %v175_v1, -inf  ;;  %s407_s4 = sshll.u32 %s613_s13, 7  ;;  %s408_s8 = sshll.u32 %s613_s13, 4 }
  0x3b   : > { %v179_v3 = vmax.f32 %v174_v0, %v178_v2  ;;  %s172_s20 = scalar_select %p171_p6, %s613_s13, 1  ;;  %v239_v25 = vshrl.u32 %v238_v24, 7 }
  0x3c   : > { %s170_s14 = scalar_lea.vmem [#allocation5], %s698_s29  ;;  %s732_s23 = scalar_lea.hbm %s778_s2, %s408_s8 }
  0x3d   : > { %v180_v4 = vrot.slane %v179_v3, 4  ;;  %s173_s3 = scalar_lea.vmem %s777_s1, %s172_s20  ;;  %v240_v30 = vadd.s32 8, %v239_v25  ;;  %s324_s16 = sshll.u32 %s170_s14, 4  ;;  %s734_s16 = int_to_ptr.vmem [resolvable:$true] %s324_s16 }
  0x3e   : > { %v406_v31 = vld [vmem:[%s173_s3] ss:$0 sm:$0xff]  ;;  %s312_s24 = scalar_lea.sflag [#allocation4], %s698_s29  ;;  %s504_s25 = scalar_lea.vmem %s734_s16, 16 }
  0x3f   : > { %v181_v5 = vmax.f32 %v179_v3, %v180_v4  ;;  %vm246_vm1 = vcmp.eq.s32.totalorder %v240_v30, %v406_v31  ;;  %vm245_vm2 = vcmp.eq.s32.totalorder %v239_v25, %v406_v31  ;;  %p505_p11 = scmp.ne.s32.totalorder %s734_s16, %s504_s25  ;;  %p786_p12 = scmp.ne.s32.totalorder %s782_s21, 0 }
  0x40   : > { %s576_s13 = smov [#allocation5]  }
  0x41   : > { %v182_v6 = vrot.slane %v181_v5, 2  ;;  %p506_p13 = pnand %p505_p11, %p786_p12  ;;  %s508_s26 = sshll.u32 %s576_s13, 4  ;;  %s509_s26 = int_to_ptr.vmem [resolvable:$false] %s508_s26 }
  0x42   : > { %s510_s27 = scalar_lea.vmem %s509_s26, 32  ;;  %p511_p10 = scmp.lt.s32.totalorder %s734_s16, %s509_s26 }
  0x43   : > { %v183_v7 = vmax.f32 %v181_v5, %v182_v6  ;;  %p507_p4 = pneg %p506_p13  ;;  %p512_p1 = scmp.lt.s32.totalorder %s510_s27, %s504_s25 }
  0x45   : > { %v184_v8 = vrot.slane %v183_v7, 1  ;;  %p513_p3 = por %p512_p1, %p511_p10 }
  0x47   : > { %v185_v9 = vmax.f32 %v183_v7, %v184_v8  ;;  %p514_p5 = pnand %p513_p3, %p507_p4 }
  0x49   : > { %v186_v10 = vsub.f32 %v174_v0, %v185_v9  ;;  %v187_v11 = vsub.f32 %v175_v1, %v185_v9 }
  0x4b   : > { %v188_v12 = vmul.f32 1.442695, %v186_v10  ;;  %v190_v13 = vmul.f32 1.442695, %v187_v11 }
  0x4d   : > { %460 = vpow2.f32 %v188_v12 }
  0x4e   : > { %462 = vpow2.f32 %v190_v13 }
  0x57   : > { %v461_v14 = vpop.eup %460 }
  0x58   : > { %v463_v15 = vpop.eup %462 }
  0x59   : > { %v192_v16 = vsel %vm177_vm0, %v463_v15, 0.0 }
  0x5a   : > { %v193_v17 = vadd.f32 %v461_v14, %v192_v16 }
  0x5c   : > { %v194_v18 = vrot.slane %v193_v17, 4 }
  0x5e   : > { %v195_v19 = vadd.f32 %v194_v18, %v193_v17 }
  0x60   : > { %v196_v20 = vrot.slane %v195_v19, 2 }
  0x62   : > { %v197_v21 = vadd.f32 %v196_v20, %v195_v19 }
  0x64   : > { %v198_v22 = vrot.slane %v197_v21, 1 }
  0x66   : > { %v199_v23 = vadd.f32 %v198_v22, %v197_v21 }
  0x68   : > { %464 = vlog2.f32 %v199_v23 }
  0x69   : > { %466 = vrcp.f32 %v199_v23 }
  0x72   : > { %v465_v26 = vpop.eup %464 }
  0x73   : > { %v467_v27 = vpop.eup %466  ;;  %v201_v32 = vmul.f32 0.6931472, %v465_v26 }
  0x74   : > { %v206_v28 = vmul.f32 %v467_v27, %v461_v14  ;;  %v207_v29 = vmul.f32 %v467_v27, %v463_v15 }
  0x75   : > { %v203_v37 = vsub.f32 %v187_v11, %v201_v32  ;;  %v202_v40 = vsub.f32 %v186_v10, %v201_v32 }
  0x76   : > { %v208_v33 = vsub.f32 1.0, %v206_v28  ;;  %v209_v34 = vsub.f32 1.0, %v207_v29  ;;  %v272_v39 = vmax.f32 %v207_v29, 1e-07  ;;  %v271_v43 = vmax.f32 %v206_v28, 1e-07 }
  0x77   : > { %v248_v38 = vsel %vm246_vm1, %v203_v37, 0.0  ;;  %v247_v41 = vsel %vm245_vm2, %v202_v40, 0.0  ;;  %v226_v47 = vsub.f32 0.0, %v202_v40  ;;  %v227_v52 = vsub.f32 0.0, %v203_v37 }
  0x78   : > { %v210_v35 = vmax.f32 %v208_v33, 0.0  ;;  %v211_v36 = vmax.f32 %v209_v34, 0.0  ;;  %v249_v42 = vsel %vm177_vm0, %v248_v38, 0.0  ;;  %v282_v44 = vsel %vm246_vm1, %v272_v39, 0.0 }
  0x79   : > { %v273_v45 = vsel %vm177_vm0, %v272_v39, 0.0  ;;  %v250_v46 = vadd.f32 %v249_v42, %v247_v41  ;;  %v281_v48 = vsel %vm245_vm2, %v271_v43, 0.0  ;;  %v283_v49 = vsel %vm177_vm0, %v282_v44, 0.0 }
  0x7a   : > { %468 = vrsqrt.f32 %v210_v35  ;;  %vm214_vm3 = vcmp.eq.f32.partialorder %v210_v35, inf  ;;  %v217_v51 = vand.u32 2147483648, %v210_v35  ;;  %v274_v53 = vadd.f32 %v273_v45, %v271_v43 }
  0x7b   : > { %470 = vrsqrt.f32 %v211_v36  ;;  %vm216_vm4 = vcmp.eq.f32.partialorder %v210_v35, 0.0  ;;  %vm221_vm5 = vcmp.eq.f32.partialorder %v211_v36, inf  ;;  %v224_v56 = vand.u32 2147483648, %v211_v36 }
  0x7c   : > { %vm223_vm6 = vcmp.eq.f32.partialorder %v211_v36, 0.0  ;;  %v251_v58 = vrot.slane %v250_v46, 4  ;;  %v284_v59 = vadd.f32 %v283_v49, %v281_v48  ;;  %v275_v2 = vrot.slane %v274_v53, 4 }
  0x7e   : > { %v252_v4 = vadd.f32 %v251_v58, %v250_v46  ;;  %v285_v6 = vrot.slane %v284_v59, 4  ;;  %v276_v13 = vadd.f32 %v275_v2, %v274_v53 }
  0x80   : > { %v253_v11 = vrot.slane %v252_v4, 2  ;;  %v286_v14 = vadd.f32 %v285_v6, %v284_v59  ;;  %v277_v20 = vrot.slane %v276_v13, 2 }
  0x82   : > { %v254_v18 = vadd.f32 %v253_v11, %v252_v4  ;;  %v287_v21 = vrot.slane %v286_v14, 2  ;;  %v278_v27 = vadd.f32 %v277_v20, %v276_v13 }
  0x84   : > { %v469_v50 = vpop.eup %468  ;;  %v255_v25 = vrot.slane %v254_v18, 1  ;;  %v288_v28 = vadd.f32 %v287_v21, %v286_v14  ;;  %v279_v33 = vrot.slane %v278_v27, 1 }
  0x85   : > { %v471_v54 = vpop.eup %470  ;;  %v213_v55 = vmul.f32 %v469_v50, %v210_v35 }
  0x86   : > { %v220_v57 = vmul.f32 %v471_v54, %v211_v36  ;;  %v256_v31 = vadd.f32 %v255_v25, %v254_v18  ;;  %v289_v34 = vrot.slane %v288_v28, 1  ;;  %v280_v39 = vadd.f32 %v279_v33, %v278_v27 }
  0x87   : > { %v215_v60 = vsel %vm214_vm3, %v210_v35, %v213_v55  ;;  %v294_v35 = vand.u32 127, %v238_v24 }
  0x88   : > { %v218_v61 = vsel %vm216_vm4, %v217_v51, %v215_v60  ;;  %v222_v62 = vsel %vm221_vm5, %v211_v36, %v220_v57  ;;  %v296_v36 = vstv %s407_s4  ;;  %v267_v38 = vsub.f32 0.0, %v256_v31 }
  0x89   : > { %v225_v63 = vsel %vm223_vm6, %v224_v56, %v222_v62  ;;  %v228_v0 = vmul.f32 %v226_v47, %v218_v61  ;;  %v257_v1 = vsel %vm245_vm2, %v218_v61, 0.0  ;;  %v290_v40 = vadd.f32 %v289_v34, %v288_v28 }
  0x8a   : > { %v229_v3 = vmul.f32 %v227_v52, %v225_v63  ;;  %v258_v5 = vsel %vm246_vm1, %v225_v63, 0.0  ;;  %v297_v41 = vadd.s32 %v296_v36, %v294_v35  ;;  %vm305_vm8 = vcmp.eq.s32.totalorder %v294_v35, 0 }
  0x8b   : > { %v259_v7 = vsel %vm177_vm0, %v258_v5, 0.0  ;;  %v291_v43 = vsub.f32 %v280_v39, %v290_v40  ;;  %vm307_vm9 = vcmp.eq.s32.totalorder %v294_v35, 1 }
  0x8c   : > { %v230_v8 = vsel %vm177_vm0, %v229_v3, 0.0  ;;  %v260_v9 = vadd.f32 %v259_v7, %v257_v1  ;;  %vm298_vm7 = vcmp.lt.s32.totalorder %v297_v41, 256 }
  0x8d   : > { %v231_v10 = vadd.f32 %v230_v8, %v228_v0  ;;  %v292_v46 = vmul.f32 9.2103405, %v291_v43 }
  0x8e   : > { %v261_v12 = vrot.slane %v260_v9, 4 }
  0x8f   : > { %v232_v15 = vrot.slane %v231_v10, 4  ;;  %v302_v48 = vsel %vm298_vm7, %v292_v46, 0.0 }
  0x90   : > { %v262_v16 = vadd.f32 %v261_v12, %v260_v9 }
  0x91   : > { %v233_v17 = vadd.f32 %v232_v15, %v231_v10 }
  0x92   : > { %v263_v19 = vrot.slane %v262_v16, 2 }
  0x93   : > { %v234_v22 = vrot.slane %v233_v17, 2 }
  0x94   : > { %v264_v26 = vadd.f32 %v263_v19, %v262_v16 }
  0x95   : > { %v235_v23 = vadd.f32 %v234_v22, %v233_v17 }
  0x96   : > { %v265_v32 = vrot.slane %v264_v26, 1 }
  0x97   : > { %v236_v29 = vrot.slane %v235_v23, 1 }
  0x98   : > { %v266_v37 = vadd.f32 %v265_v32, %v264_v26 }
  0x99   : > { %v237_v30 = vadd.f32 %v236_v29, %v235_v23 }
  0x9a   : > { %v268_v42 = vmul.f32 %v267_v38, %v266_v37 }
  0x9b   : > { %472 = vrcp.f32 %v237_v30 }
  0xa5   : > { %v473_v44 = vpop.eup %472 }
  0xa6   : > { %v270_v45 = vmul.f32 %v473_v44, %v268_v42 }
  0xa8   : > { %v299_v47 = vsel %vm298_vm7, %v270_v45, 0.0 }
  0xa9   : > { %300 = vadd.xlane.f32.xlu0 %v299_v47 }
  0xad   : > { %303 = vadd.xlane.f32.xlu0 %v302_v48 }
 0x136   : > { %v301_v24 = vpop.xlane.xlu0 %300 }
 0x137   : > { %v306_v50 = vsel %vm305_vm8, %v301_v24, 0.0 }
 0x13a   : > { %v304_v49 = vpop.xlane.xlu0 %303 }
 0x13b   : > { %v308_v51 = vsel %vm307_vm9, %v304_v49, 0.0 }
 0x13c   : > { %v309_v52 = vadd.f32 %v308_v51, %v306_v50 }
 0x13e   : > { %310 = vst [vmem:[%s170_s14] sm:$0x1] %v309_v52 }
 0x13f   : > { %517 = shalt.err (!%p514_p5)
}
 0x140   : > { %s518_s29 = scalar_lea.hbm %s732_s23, 16  ;;  %s522_s7 = scalar_lea.hbm %s778_s2, 32 }
 0x141   : > { %p519_p7 = scmp.ne.s32.totalorder %s732_s23, %s518_s29  ;;  %p523_p0 = scmp.lt.u32.totalorder %s732_s23, %s778_s2 }
 0x142   : > { %p524_p2 = scmp.lt.u32.totalorder %s522_s7, %s518_s29  ;;  %p526_p11 = scmp.lt.u32.totalorder %s518_s29, %s732_s23 }
 0x143   : > { %p520_p8 = pnand %p519_p7, %p786_p12 }
 0x144   : > { %p525_p6 = por %p524_p2, %p523_p0 }
 0x145   : > { %p521_p9 = pneg %p520_p8 }
 0x146   : > { %p527_p13 = por %p526_p11, %p525_p6 }
 0x148   : > { %p528_p4 = pnand %p527_p13, %p521_p9 }
 0x14a   : > { %531 = shalt.err (!%p528_p4)
}
 0x14b   : > { %413 = dma.vmem_to_hbm [thread:$0]  (%p786_p12), %s734_s16, 16, %s732_s23, %s312_s24  }
 0x14c PF: > { %s336_s30 = sand.u32 1, %s558_s9   ;;  %p787_p10 = scmp.ne.s32.totalorder %s783_s22, 0 }
 0x14d   : > { %p788_p1 = scmp.ge.s32.totalorder %s570_s12, 2  ;;  %s337_s3 = scalar_lea.sflag [#allocation4], %s336_s30 }
 0x14f   : > { %p420_p3 = pnand %p788_p1, %p787_p10 }
 0x151   : > { %553 = dma.done.wait (!%p420_p3), %s337_s3, 16  }
 0x152   : > { %555 = vsyncadd (!%p420_p3), %s337_s3, 4294967280  ;;  %p15_p5 = scmp.ge.s32.totalorder %s617_s15, 4   ;;  %s789_s9 = smov %s562_s10 }
 0x153   : > { %s790_s10 = smov %s566_s11  ;;  %s791_s11 = smov %s629_s18 }
 0x154   : > { %s792_s12 = smov %s617_s15  ;;  %17 = sbr.rel (!%p15_p5) target bundleno = 5 (0x5), region = 76 }
 0x15b   :  { %341 = vsyncpa [#allocation3], 1 }
 0x15c   :  { %343 = vsyncpa [#allocation3 + $0x1], 1 }
 0x15d   :  { %344 = vsyncpa [#allocation4], 1 }
 0x15e   :  { %346 = vsyncpa [#allocation4 + $0x1], 1 }

</bundles_post_ra>
